<compile_context>
chip_gen: v6e
topology: v6e:2x2x1
jax: 0.10.0
libtpu: 0.0.40
codegen_flags: <defaults>
</compile_context>

<pallas_src>
import jax
import jax.numpy as jnp
import numpy as np
from jax.experimental import pallas as pl
from jax.experimental.pallas import tpu as pltpu

LANE = 128     # pad hidden / class dims to a multiple of the TPU lane width


def _round_up(x, m):
    return (x + m - 1) // m * m


def _pick_b_tile(bsz):
    # MXU-friendly M.  Very large batches use 256-row tiles (fills v6e/v7x MXU
    # rows, still >=2 "parallel" tiles for v7x's two TensorCores); smaller
    # batches use one tile of up to 128 rows so single-TC chips (v5e/v6e) run
    # the sequential recurrence only once.
    if bsz >= 512:
        return 256
    return min(128, _round_up(bsz, 8))


# -----------------------------------------------------------------------------
# Kernel
# -----------------------------------------------------------------------------
def _lstm_kernel(tmax_ref,            # SMEM (n_tiles,) i32: per-tile max length (scalar prefetch)
                 x_hbm,               # HBM  (S, n_tiles, BT, 4Hp) f32 pre-projected gate inputs
                 len_ref,             # VMEM (BT, 1) i32 sequence lengths
                 mask_ref,            # VMEM (BT, 1) f32, 1.0 iff length == max(length)
                 w_hh0_ref,           # VMEM (Hp, 4Hp)   layer-0 recurrent weights
                 w1_ref,              # VMEM (2Hp, 4Hp)  [W_ih1 ; W_hh1] stacked
                 b1_ref,              # VMEM (1, 4Hp)    layer-1 bias
                 w_fc_ref, b_fc_ref,  # VMEM (Hp, Cp), (1, Cp)
                 out_ref,             # VMEM (BT, Cp) f32 log-probs
                 x_buf, sem,          # (2, BT, 4Hp) f32 double buffer + DMA sems (2,)
                 hcat, c1, c2):       # (BT, 2Hp) = [h1 | h2], (BT, Hp) cell states
    tile = pl.program_id(0)
    hp = c1.shape[-1]
    t_max = tmax_ref[tile]            # recurrence only runs to this tile's max length

    def sigmoid(z):                   # 0.5*(tanh(z/2)+1): 1 EUP op + 1 FMA per gate
        return 0.5 * jnp.tanh(0.5 * z) + 0.5

    def slab(t, slot):                # one contiguous (BT, 4Hp) DMA per timestep
        return pltpu.make_async_copy(x_hbm.at[t, tile], x_buf.at[slot], sem.at[slot])

    @pl.when(t_max > 0)
    def _():
        slab(0, 0).start()            # prime the pipeline

    hcat[...] = jnp.zeros_like(hcat)
    c1[...] = jnp.zeros_like(c1)
    c2[...] = jnp.zeros_like(c2)

    @pl.loop(0, t_max)
    def _(t):
        slot = t & 1

        # Issue the NEXT step's gather before waiting on the current one so the
        # HBM fetch fully overlaps this step's cell math.
        @pl.when(t + 1 < t_max)
        def _():
            slab(t + 1, 1 - slot).start()

        slab(t, slot).wait()          # identical descriptor to the one started

        valid = len_ref[...] > t      # packed-sequence mask: advance while t < len

        # ---- layer 0: x @ W_ih0 + b0 is already folded into the slab ----
        g0 = x_buf[slot] + jnp.dot(hcat[:, 0:hp], w_hh0_ref[...],
                                   preferred_element_type=jnp.float32)
        i0 = sigmoid(g0[:, 0 * hp:1 * hp])
        f0 = sigmoid(g0[:, 1 * hp:2 * hp])
        z0 = jnp.tanh(g0[:, 2 * hp:3 * hp])
        o0 = sigmoid(g0[:, 3 * hp:4 * hp])
        c1n = f0 * c1[...] + i0 * z0
        h1n = o0 * jnp.tanh(c1n)
        c1[...] = jnp.where(valid, c1n, c1[...])
        hcat[:, 0:hp] = jnp.where(valid, h1n, hcat[:, 0:hp])

        # ---- layer 1: single fused matmul over [h1_new | h2_old] ----
        # TODO(synk): nn.LSTM inter-layer dropout and nn.Dropout are train-only
        # stochastic ops; this kernel implements the eval-mode forward (identity).
        g1 = jnp.dot(hcat[...], w1_ref[...],
                     preferred_element_type=jnp.float32) + b1_ref[...]
        i1 = sigmoid(g1[:, 0 * hp:1 * hp])
        f1 = sigmoid(g1[:, 1 * hp:2 * hp])
        z1 = jnp.tanh(g1[:, 2 * hp:3 * hp])
        o1 = sigmoid(g1[:, 3 * hp:4 * hp])
        c2n = f1 * c2[...] + i1 * z1
        h2n = o1 * jnp.tanh(c2n)
        c2[...] = jnp.where(valid, c2n, c2[...])
        hcat[:, hp:2 * hp] = jnp.where(valid, h2n, hcat[:, hp:2 * hp])

    # Epilogue: pad_packed_sequence(...)[:, -1, :] == top-layer hidden at the
    # last valid step for rows with length == max(length), zeros otherwise.
    feat = jnp.maximum(hcat[:, hp:2 * hp] * mask_ref[...], 0.0)          # relu
    logits = (jnp.dot(feat, w_fc_ref[...], preferred_element_type=jnp.float32)
              + b_fc_ref[...])        # pad class lanes carry a -1e30 bias (f32-safe)
    m = jnp.max(logits, axis=-1, keepdims=True)
    shifted = logits - m
    lse = jnp.log(jnp.sum(jnp.exp(shifted), axis=-1, keepdims=True))
    out_ref[...] = shifted - lse      # stable log_softmax, f32


# -----------------------------------------------------------------------------
# Wrapper
# -----------------------------------------------------------------------------
def _pack_gate_matrix(w, h, hp):
    """PyTorch (4H, H) gate-stacked LSTM weight -> zero-padded (Hp, 4Hp) x@W layout."""
    w4 = w.reshape(4, h, h)                                   # (gate, out, in)
    w4 = jnp.pad(w4, ((0, 0), (0, hp - h), (0, hp - h)))
    return jnp.transpose(w4, (2, 0, 1)).reshape(hp, 4 * hp)   # (in, gate*out)


def _pack_gate_bias(b_ih, b_hh, h, hp):
    b = (b_ih + b_hh).reshape(4, h)
    return jnp.pad(b, ((0, 0), (0, hp - h))).reshape(1, 4 * hp)


@jax.jit
def lstm_net_forward(text, lengths, emb, w_ih0, w_hh0, b_ih0, b_hh0,
                     w_ih1, w_hh1, b_ih1, b_hh1, fc_w, fc_b):
    """Eval-mode LSTMNet forward: log_softmax(fc(relu(lstm(emb(text))[:, -1])))."""
    bsz, seq = text.shape
    hidden = emb.shape[1]
    n_cls = fc_w.shape[0]
    hp = _round_up(hidden, LANE)
    cp = _round_up(n_cls, LANE)
    b_tile = _pick_b_tile(bsz)
    bp = _round_up(bsz, b_tile)
    n_tiles = bp // b_tile

    # --- weight packing (layout plumbing) ---
    wih0 = _pack_gate_matrix(w_ih0, hidden, hp)
    whh0 = _pack_gate_matrix(w_hh0, hidden, hp)
    b0 = _pack_gate_bias(b_ih0, b_hh0, hidden, hp)
    wih1 = _pack_gate_matrix(w_ih1, hidden, hp)
    whh1 = _pack_gate_matrix(w_hh1, hidden, hp)
    b1 = _pack_gate_bias(b_ih1, b_hh1, hidden, hp)
    w1 = jnp.concatenate([wih1, whh1], axis=0)                # (2Hp, 4Hp)
    wfc = jnp.pad(fc_w.T, ((0, hp - hidden), (0, cp - n_cls)))
    bfc = jnp.pad(fc_b, ((0, cp - n_cls),), constant_values=-1e30).reshape(1, cp)

    # --- embedding pre-projection: removes layer-0's input matmul from the
    # sequential recurrence and makes each gathered row 4x larger.  (In a
    # weight-stationary serving loop this table can be cached across calls.) ---
    emb_p = emb.at[0].set(0.0)                                # padding_idx = 0
    emb_p = jnp.pad(emb_p, ((0, 0), (0, hp - hidden)))
    emb_proj = jnp.dot(emb_p, wih0, preferred_element_type=jnp.float32) + b0

    # --- batched gather (full-bandwidth XLA gather), laid out time-major so the
    # kernel streams one contiguous (B_TILE, 4Hp) slab per timestep ---
    ids = jnp.pad(text.astype(jnp.int32), ((0, bp - bsz), (0, 0)))
    x_gates = jnp.take(emb_proj, ids.T, axis=0)               # (S, Bp, 4Hp)
    x_gates = x_gates.reshape(seq, n_tiles, b_tile, 4 * hp)

    lens = jnp.minimum(lengths.astype(jnp.int32), seq)
    lens = jnp.pad(lens, ((0, bp - bsz),))
    len_col = lens.reshape(bp, 1)
    t_eff = jnp.max(lens[:bsz])                               # pad_packed pads to max(length)
    final_mask = (lens == t_eff).astype(jnp.float32).reshape(bp, 1)
    tile_tmax = jnp.max(lens.reshape(n_tiles, b_tile), axis=1).astype(jnp.int32)

    row_spec = lambda shape: pl.BlockSpec(shape, lambda i, tmax: (i, 0))
    const_spec = lambda shape: pl.BlockSpec(shape, lambda i, tmax: (0, 0))

    out = pl.pallas_call(
        _lstm_kernel,
        out_shape=jax.ShapeDtypeStruct((bp, cp), jnp.float32),
        grid_spec=pltpu.PrefetchScalarGridSpec(
            num_scalar_prefetch=1,                            # per-tile max lengths -> SMEM
            grid=(n_tiles,),                                  # batch tiles only
            in_specs=[
                pl.BlockSpec(memory_space=pl.ANY),            # pre-projected slabs stay in HBM
                row_spec((b_tile, 1)),                        # lengths
                row_spec((b_tile, 1)),                        # final-step validity mask
                const_spec((hp, 4 * hp)),                     # W_hh layer 0 (resident)
                const_spec((2 * hp, 4 * hp)),                 # [W_ih ; W_hh] layer 1 (resident)
                const_spec((1, 4 * hp)),                      # bias layer 1
                const_spec((hp, cp)),                         # fc weight
                const_spec((1, cp)),                          # fc bias (-1e30 on pad lanes)
            ],
            out_specs=row_spec((b_tile, cp)),                 # lane-dense (Cp = 128k) output
            scratch_shapes=[
                pltpu.VMEM((2, b_tile, 4 * hp), jnp.float32), # double-buffered gate slabs
                pltpu.SemaphoreType.DMA((2,)),
                pltpu.VMEM((b_tile, 2 * hp), jnp.float32),    # hcat = [h1 | h2]
                pltpu.VMEM((b_tile, hp), jnp.float32),        # c1
                pltpu.VMEM((b_tile, hp), jnp.float32),        # c2
            ],
        ),
        compiler_params=pltpu.CompilerParams(
            dimension_semantics=("parallel",),                # batch tiles -> 2 TCs on v7x
            vmem_limit_bytes=32 * 1024 * 1024,                # actual footprint is a few MiB
        ),
    )(tile_tmax, x_gates, len_col, final_mask, whh0, w1, b1, wfc, bfc)

    return out[:bsz, :n_cls]


# -----------------------------------------------------------------------------
# Pure-JAX reference (same eval-mode semantics) + demo
# -----------------------------------------------------------------------------
def lstm_net_reference(text, lengths, emb, w_ih0, w_hh0, b_ih0, b_hh0,
                       w_ih1, w_hh1, b_ih1, b_hh1, fc_w, fc_b):
    bsz, seq = text.shape
    hidden = emb.shape[1]
    table = emb.at[0].set(0.0)
    x = table[text]                                           # (B, S, H)

    def cell(x_t, h, c, w_ih, w_hh, b_ih, b_hh):
        g = x_t @ w_ih.T + b_ih + h @ w_hh.T + b_hh
        i, f, gg, o = jnp.split(g, 4, axis=-1)
        i = jax.nn.sigmoid(i)
        f = jax.nn.sigmoid(f)
        gg = jnp.tanh(gg)
        o = jax.nn.sigmoid(o)
        c_new = f * c + i * gg
        return o * jnp.tanh(c_new), c_new

    h1 = c1 = h2 = c2 = jnp.zeros((bsz, hidden), jnp.float32)
    for t in range(seq):
        valid = (lengths > t)[:, None]
        h1n, c1n = cell(x[:, t], h1, c1, w_ih0, w_hh0, b_ih0, b_hh0)
        h2n, c2n = cell(h1n, h2, c2, w_ih1, w_hh1, b_ih1, b_hh1)
        h1 = jnp.where(valid, h1n, h1)
        c1 = jnp.where(valid, c1n, c1)
        h2 = jnp.where(valid, h2n, h2)
        c2 = jnp.where(valid, c2n, c2)

    last = jnp.where((lengths == jnp.max(lengths))[:, None], h2, 0.0)
    logits = jnp.maximum(last, 0.0) @ fc_w.T + fc_b
    return jax.nn.log_softmax(logits, axis=-1)


if __name__ == "__main__":
    key = jax.random.PRNGKey(0)
    vocab, hidden, n_cls = 200, 32, 10     # small LSTMNet(hidden_dim=32) config
    bsz, seq = 2, 8
    ks = jax.random.split(key, 12)

    def init(k, shape, scale=0.2):
        return scale * jax.random.normal(k, shape, jnp.float32)

    emb = init(ks[0], (vocab, hidden), 1.0)
    w_ih0, w_hh0 = init(ks[1], (4 * hidden, hidden)), init(ks[2], (4 * hidden, hidden))
    b_ih0, b_hh0 = init(ks[3], (4 * hidden,)), init(ks[4], (4 * hidden,))
    w_ih1, w_hh1 = init(ks[5], (4 * hidden, hidden)), init(ks[6], (4 * hidden, hidden))
    b_ih1, b_hh1 = init(ks[7], (4 * hidden,)), init(ks[8], (4 * hidden,))
    fc_w, fc_b = init(ks[9], (n_cls, hidden)), init(ks[10], (n_cls,))

    lengths = jnp.array([8, 5], dtype=jnp.int32)
    text = jax.random.randint(ks[11], (bsz, seq), 1, vocab, dtype=jnp.int32)
    text = jnp.where(jnp.arange(seq)[None, :] < lengths[:, None], text, 0)  # pad = 0

    out = lstm_net_forward(text, lengths, emb, w_ih0, w_hh0, b_ih0, b_hh0,
                           w_ih1, w_hh1, b_ih1, b_hh1, fc_w, fc_b)
    out = jax.block_until_ready(out)

    ref = lstm_net_reference(text, lengths, emb, w_ih0, w_hh0, b_ih0, b_hh0,
                             w_ih1, w_hh1, b_ih1, b_hh1, fc_w, fc_b)
    assert out.shape == (bsz, n_cls)
    np.testing.assert_allclose(np.asarray(out), np.asarray(ref), rtol=1e-2, atol=1e-2)
    print("KERNEL_OK")
</pallas_src>

<mosaic_0001>
module attributes {stable_mosaic.version = 11 : i64} {
  func.func @_lstm_kernel(%arg0: i32, %arg1: memref<1xi32, #tpu.memory_space<smem>>, %arg2: memref<8x1x8x512xf32, #tpu.memory_space<any>>, %arg3: memref<8x1xi32, #tpu.memory_space<vmem>>, %arg4: memref<8x1xf32, #tpu.memory_space<vmem>>, %arg5: memref<128x512xf32, #tpu.memory_space<vmem>>, %arg6: memref<256x512xf32, #tpu.memory_space<vmem>>, %arg7: memref<1x512xf32, #tpu.memory_space<vmem>>, %arg8: memref<128x128xf32, #tpu.memory_space<vmem>>, %arg9: memref<1x128xf32, #tpu.memory_space<vmem>>, %arg10: memref<8x128xf32, #tpu.memory_space<vmem>>, %arg11: memref<2x8x512xf32, #tpu.memory_space<vmem>>, %arg12: memref<2x!tpu.dma_semaphore, #tpu.memory_space<semaphore_mem>>, %arg13: memref<8x256xf32, #tpu.memory_space<vmem>>, %arg14: memref<8x128xf32, #tpu.memory_space<vmem>>, %arg15: memref<8x128xf32, #tpu.memory_space<vmem>>) attributes {dimension_semantics = [#tpu.dimension_semantics<parallel>], iteration_bounds = array<i64: 1>, scalar_prefetch = 1 : i64, scratch_operands = 5 : i64, tpu.core_type = #tpu.core_type<tc>, window_params = [{}, {transform_indices = @transform_1, window_bounds = array<i64: 8, 1>}, {transform_indices = @transform_2, window_bounds = array<i64: 8, 1>}, {pipeline_mode = #tpu.pipeline_mode<synchronous>, transform_indices = @transform_3, window_bounds = array<i64: 128, 512>}, {pipeline_mode = #tpu.pipeline_mode<synchronous>, transform_indices = @transform_4, window_bounds = array<i64: 256, 512>}, {pipeline_mode = #tpu.pipeline_mode<synchronous>, transform_indices = @transform_5, window_bounds = array<i64: 1, 512>}, {pipeline_mode = #tpu.pipeline_mode<synchronous>, transform_indices = @transform_6, window_bounds = array<i64: 128, 128>}, {pipeline_mode = #tpu.pipeline_mode<synchronous>, transform_indices = @transform_7, window_bounds = array<i64: 1, 128>}, {transform_indices = @transform_8, window_bounds = array<i64: 8, 128>}]} {
    %0 = arith.index_cast %arg0 : i32 to index
    %1 = memref.load %arg1[%0] : memref<1xi32, #tpu.memory_space<smem>>
    %c0_i32 = arith.constant 0 : i32
    %2 = arith.cmpi sgt, %1, %c0_i32 : i32
    %3 = arith.extui %2 : i1 to i32
    %c0_i32_0 = arith.constant 0 : i32
    %4 = arith.cmpi ne, %3, %c0_i32_0 : i32
    scf.if %4 {
      %c0_i32_28 = arith.constant 0 : i32
      %c0_i32_29 = arith.constant 0 : i32
      %c0_i32_30 = arith.constant 0 : i32
      %c0_i32_31 = arith.constant 0 : i32
      %c0_i32_32 = arith.constant 0 : i32
      %39 = tpu.memref_slice %arg2[%c0_i32_28, %arg0, %c0_i32_31, %c0_i32_32] : memref<8x1x8x512xf32, #tpu.memory_space<any>> -> memref<1x1x8x512xf32, #tpu.memory_space<any>>
      %40 = tpu.memref_squeeze %39 : memref<1x1x8x512xf32, #tpu.memory_space<any>> -> memref<8x512xf32, #tpu.memory_space<any>>
      %c0_i32_33 = arith.constant 0 : i32
      %c0_i32_34 = arith.constant 0 : i32
      %41 = tpu.memref_slice %arg11[%c0_i32_29, %c0_i32_33, %c0_i32_34] : memref<2x8x512xf32, #tpu.memory_space<vmem>> -> memref<1x8x512xf32, #tpu.memory_space<vmem>>
      %42 = tpu.memref_squeeze %41 : memref<1x8x512xf32, #tpu.memory_space<vmem>> -> memref<8x512xf32, #tpu.memory_space<vmem>>
      %43 = tpu.memref_slice %arg12[%c0_i32_30] : memref<2x!tpu.dma_semaphore, #tpu.memory_space<semaphore_mem>> -> memref<1x!tpu.dma_semaphore, #tpu.memory_space<semaphore_mem>>
      %44 = tpu.memref_squeeze %43 : memref<1x!tpu.dma_semaphore, #tpu.memory_space<semaphore_mem>> -> memref<!tpu.dma_semaphore, #tpu.memory_space<semaphore_mem>>
      tpu.enqueue_dma source(%40 : memref<8x512xf32, #tpu.memory_space<any>>) target(%42 : memref<8x512xf32, #tpu.memory_space<vmem>>) target_semaphore(%44 : memref<!tpu.dma_semaphore, #tpu.memory_space<semaphore_mem>>)
    } else {
    }
    %cst = arith.constant 0.000000e+00 : f32
    %5 = vector.broadcast %cst : f32 to vector<8x256xf32>
    %c0 = arith.constant 0 : index
    %c0_1 = arith.constant 0 : index
    %6 = vector.load %arg13[%c0, %c0_1] : memref<8x256xf32, #tpu.memory_space<vmem>>, vector<8x256xf32>
    tpu.vector_store %arg13[%c0, %c0_1], %5 {strides = array<i32>} : memref<8x256xf32, #tpu.memory_space<vmem>>, vector<8x256xf32>,
    %cst_2 = arith.constant 0.000000e+00 : f32
    %7 = vector.broadcast %cst_2 : f32 to vector<8x128xf32>
    %c0_3 = arith.constant 0 : index
    %c0_4 = arith.constant 0 : index
    %8 = vector.load %arg14[%c0_3, %c0_4] : memref<8x128xf32, #tpu.memory_space<vmem>>, vector<8x128xf32>
    tpu.vector_store %arg14[%c0_3, %c0_4], %7 {strides = array<i32>} : memref<8x128xf32, #tpu.memory_space<vmem>>, vector<8x128xf32>,
    %cst_5 = arith.constant 0.000000e+00 : f32
    %9 = vector.broadcast %cst_5 : f32 to vector<8x128xf32>
    %c0_6 = arith.constant 0 : index
    %c0_7 = arith.constant 0 : index
    %10 = vector.load %arg15[%c0_6, %c0_7] : memref<8x128xf32, #tpu.memory_space<vmem>>, vector<8x128xf32>
    tpu.vector_store %arg15[%c0_6, %c0_7], %9 {strides = array<i32>} : memref<8x128xf32, #tpu.memory_space<vmem>>, vector<8x128xf32>,
    %c0_i32_8 = arith.constant 0 : i32
    %11 = arith.subi %1, %c0_i32_8 : i32
    %c1_i32 = arith.constant 1 : i32
    %c1_i32_9 = arith.constant 1 : i32
    %12 = arith.subi %c1_i32, %c1_i32_9 : i32
    %13 = arith.addi %11, %12 : i32
    %c1_i32_10 = arith.constant 1 : i32
    %14 = arith.divsi %13, %c1_i32_10 : i32
    %c1_i32_11 = arith.constant 1 : i32
    %c0_i32_12 = arith.constant 0 : i32
    %c0_i32_13 = arith.constant 0 : i32
    %15 = arith.subi %14, %c0_i32_13 : i32
    %16 = arith.addi %c0_i32_13, %15 : i32
    %c1_i32_14 = arith.constant 1 : i32
    scf.for %arg16 = %c0_i32_13 to %16 step %c1_i32_14  : i32 {
      %39 = arith.muli %arg16, %c1_i32_11 : i32
      %40 = arith.addi %c0_i32_12, %39 : i32
      %c1_i32_28 = arith.constant 1 : i32
      %41 = arith.andi %40, %c1_i32_28 : i32
      %c1_i32_29 = arith.constant 1 : i32
      %42 = arith.addi %40, %c1_i32_29 : i32
      %43 = arith.cmpi slt, %42, %1 : i32
      %44 = arith.extui %43 : i1 to i32
      %c0_i32_30 = arith.constant 0 : i32
      %45 = arith.cmpi ne, %44, %c0_i32_30 : i32
      scf.if %45 {
        %c1_i32_89 = arith.constant 1 : i32
        %152 = arith.addi %40, %c1_i32_89 : i32
        %c1_i32_90 = arith.constant 1 : i32
        %153 = arith.subi %c1_i32_90, %41 : i32
        %c0_i32_91 = arith.constant 0 : i32
        %c0_i32_92 = arith.constant 0 : i32
        %154 = tpu.memref_slice %arg2[%152, %arg0, %c0_i32_91, %c0_i32_92] : memref<8x1x8x512xf32, #tpu.memory_space<any>> -> memref<1x1x8x512xf32, #tpu.memory_space<any>>
        %155 = tpu.memref_squeeze %154 : memref<1x1x8x512xf32, #tpu.memory_space<any>> -> memref<8x512xf32, #tpu.memory_space<any>>
        %c0_i32_93 = arith.constant 0 : i32
        %c0_i32_94 = arith.constant 0 : i32
        %156 = tpu.memref_slice %arg11[%153, %c0_i32_93, %c0_i32_94] : memref<2x8x512xf32, #tpu.memory_space<vmem>> -> memref<1x8x512xf32, #tpu.memory_space<vmem>>
        %157 = tpu.memref_squeeze %156 : memref<1x8x512xf32, #tpu.memory_space<vmem>> -> memref<8x512xf32, #tpu.memory_space<vmem>>
        %158 = tpu.memref_slice %arg12[%153] : memref<2x!tpu.dma_semaphore, #tpu.memory_space<semaphore_mem>> -> memref<1x!tpu.dma_semaphore, #tpu.memory_space<semaphore_mem>>
        %159 = tpu.memref_squeeze %158 : memref<1x!tpu.dma_semaphore, #tpu.memory_space<semaphore_mem>> -> memref<!tpu.dma_semaphore, #tpu.memory_space<semaphore_mem>>
        tpu.enqueue_dma source(%155 : memref<8x512xf32, #tpu.memory_space<any>>) target(%157 : memref<8x512xf32, #tpu.memory_space<vmem>>) target_semaphore(%159 : memref<!tpu.dma_semaphore, #tpu.memory_space<semaphore_mem>>)
      } else {
      }
      %c0_i32_31 = arith.constant 0 : i32
      %c0_i32_32 = arith.constant 0 : i32
      %46 = tpu.memref_slice %arg2[%40, %arg0, %c0_i32_31, %c0_i32_32] : memref<8x1x8x512xf32, #tpu.memory_space<any>> -> memref<1x1x8x512xf32, #tpu.memory_space<any>>
      %47 = tpu.memref_squeeze %46 : memref<1x1x8x512xf32, #tpu.memory_space<any>> -> memref<8x512xf32, #tpu.memory_space<any>>
      %c0_i32_33 = arith.constant 0 : i32
      %c0_i32_34 = arith.constant 0 : i32
      %48 = tpu.memref_slice %arg11[%41, %c0_i32_33, %c0_i32_34] : memref<2x8x512xf32, #tpu.memory_space<vmem>> -> memref<1x8x512xf32, #tpu.memory_space<vmem>>
      %49 = tpu.memref_squeeze %48 : memref<1x8x512xf32, #tpu.memory_space<vmem>> -> memref<8x512xf32, #tpu.memory_space<vmem>>
      %50 = tpu.memref_slice %arg12[%41] : memref<2x!tpu.dma_semaphore, #tpu.memory_space<semaphore_mem>> -> memref<1x!tpu.dma_semaphore, #tpu.memory_space<semaphore_mem>>
      %51 = tpu.memref_squeeze %50 : memref<1x!tpu.dma_semaphore, #tpu.memory_space<semaphore_mem>> -> memref<!tpu.dma_semaphore, #tpu.memory_space<semaphore_mem>>
      tpu.wait_dma2 semaphore(%51 : memref<!tpu.dma_semaphore, #tpu.memory_space<semaphore_mem>>) src(%47 : memref<8x512xf32, #tpu.memory_space<any>>) dst(%49 : memref<8x512xf32, #tpu.memory_space<vmem>>)
      %c0_35 = arith.constant 0 : index
      %c0_36 = arith.constant 0 : index
      %52 = vector.load %arg3[%c0_35, %c0_36] : memref<8x1xi32, #tpu.memory_space<vmem>>, vector<8x1xi32>
      %53 = vector.broadcast %40 : i32 to vector<8x1xi32>
      %54 = arith.cmpi sgt, %52, %53 : vector<8x1xi32>
      %55 = arith.index_cast %41 : i32 to index
      %c0_37 = arith.constant 0 : index
      %c0_38 = arith.constant 0 : index
      %56 = vector.load %arg11[%55, %c0_37, %c0_38] : memref<2x8x512xf32, #tpu.memory_space<vmem>>, vector<1x8x512xf32>
      %57 = vector.shape_cast %56 : vector<1x8x512xf32> to vector<8x512xf32>
      %c0_39 = arith.constant 0 : index
      %c0_40 = arith.constant 0 : index
      %58 = vector.load %arg13[%c0_39, %c0_40] : memref<8x256xf32, #tpu.memory_space<vmem>>, vector<8x128xf32>
      %c0_41 = arith.constant 0 : index
      %c0_42 = arith.constant 0 : index
      %59 = vector.load %arg5[%c0_41, %c0_42] : memref<128x512xf32, #tpu.memory_space<vmem>>, vector<128x512xf32>
      %cst_43 = arith.constant dense<0.000000e+00> : vector<8x512xf32>
      %60 = tpu.matmul %58, %59, %cst_43 {dimension_numbers = #tpu.dot_dimension_numbers<[1], [0], [0], [1], [0, 0, 1, 1], [], []>} : vector<8x128xf32>, vector<128x512xf32>, vector<8x512xf32> -> vector<8x512xf32>
      %61 = arith.addf %57, %60 : vector<8x512xf32>
      %62 = vector.extract_strided_slice %61 {offsets = [0, 0], sizes = [8, 128], strides = [1, 1]} : vector<8x512xf32> to vector<8x128xf32>
      %cst_44 = arith.constant 5.000000e-01 : f32
      %63 = vector.broadcast %cst_44 : f32 to vector<8x128xf32>
      %64 = arith.mulf %63, %62 : vector<8x128xf32>
      %65 = math.tanh %64 : vector<8x128xf32>
      %cst_45 = arith.constant 5.000000e-01 : f32
      %66 = vector.broadcast %cst_45 : f32 to vector<8x128xf32>
      %67 = arith.mulf %66, %65 : vector<8x128xf32>
      %cst_46 = arith.constant 5.000000e-01 : f32
      %68 = vector.broadcast %cst_46 : f32 to vector<8x128xf32>
      %69 = arith.addf %67, %68 : vector<8x128xf32>
      %70 = vector.extract_strided_slice %61 {offsets = [0, 128], sizes = [8, 128], strides = [1, 1]} : vector<8x512xf32> to vector<8x128xf32>
      %cst_47 = arith.constant 5.000000e-01 : f32
      %71 = vector.broadcast %cst_47 : f32 to vector<8x128xf32>
      %72 = arith.mulf %71, %70 : vector<8x128xf32>
      %73 = math.tanh %72 : vector<8x128xf32>
      %cst_48 = arith.constant 5.000000e-01 : f32
      %74 = vector.broadcast %cst_48 : f32 to vector<8x128xf32>
      %75 = arith.mulf %74, %73 : vector<8x128xf32>
      %cst_49 = arith.constant 5.000000e-01 : f32
      %76 = vector.broadcast %cst_49 : f32 to vector<8x128xf32>
      %77 = arith.addf %75, %76 : vector<8x128xf32>
      %78 = vector.extract_strided_slice %61 {offsets = [0, 256], sizes = [8, 128], strides = [1, 1]} : vector<8x512xf32> to vector<8x128xf32>
      %79 = math.tanh %78 : vector<8x128xf32>
      %80 = vector.extract_strided_slice %61 {offsets = [0, 384], sizes = [8, 128], strides = [1, 1]} : vector<8x512xf32> to vector<8x128xf32>
      %cst_50 = arith.constant 5.000000e-01 : f32
      %81 = vector.broadcast %cst_50 : f32 to vector<8x128xf32>
      %82 = arith.mulf %81, %80 : vector<8x128xf32>
      %83 = math.tanh %82 : vector<8x128xf32>
      %cst_51 = arith.constant 5.000000e-01 : f32
      %84 = vector.broadcast %cst_51 : f32 to vector<8x128xf32>
      %85 = arith.mulf %84, %83 : vector<8x128xf32>
      %cst_52 = arith.constant 5.000000e-01 : f32
      %86 = vector.broadcast %cst_52 : f32 to vector<8x128xf32>
      %87 = arith.addf %85, %86 : vector<8x128xf32>
      %c0_53 = arith.constant 0 : index
      %c0_54 = arith.constant 0 : index
      %88 = vector.load %arg14[%c0_53, %c0_54] : memref<8x128xf32, #tpu.memory_space<vmem>>, vector<8x128xf32>
      %89 = arith.mulf %77, %88 : vector<8x128xf32>
      %90 = arith.mulf %69, %79 : vector<8x128xf32>
      %91 = arith.addf %89, %90 : vector<8x128xf32>
      %92 = math.tanh %91 : vector<8x128xf32>
      %93 = arith.mulf %87, %92 : vector<8x128xf32>
      %c0_55 = arith.constant 0 : index
      %c0_56 = arith.constant 0 : index
      %94 = vector.load %arg14[%c0_55, %c0_56] : memref<8x128xf32, #tpu.memory_space<vmem>>, vector<8x128xf32>
      %95 = vector.shape_cast %54 : vector<8x1xi1> to vector<8x1xi1>
      %96 = vector.broadcast %95 : vector<8x1xi1> to vector<8x128xi1>
      %97 = arith.select %96, %91, %94 : vector<8x128xi1>, vector<8x128xf32>
      %c0_57 = arith.constant 0 : index
      %c0_58 = arith.constant 0 : index
      %98 = vector.load %arg14[%c0_57, %c0_58] : memref<8x128xf32, #tpu.memory_space<vmem>>, vector<8x128xf32>
      tpu.vector_store %arg14[%c0_57, %c0_58], %97 {strides = array<i32>} : memref<8x128xf32, #tpu.memory_space<vmem>>, vector<8x128xf32>,
      %c0_59 = arith.constant 0 : index
      %c0_60 = arith.constant 0 : index
      %99 = vector.load %arg13[%c0_59, %c0_60] : memref<8x256xf32, #tpu.memory_space<vmem>>, vector<8x128xf32>
      %100 = vector.shape_cast %54 : vector<8x1xi1> to vector<8x1xi1>
      %101 = vector.broadcast %100 : vector<8x1xi1> to vector<8x128xi1>
      %102 = arith.select %101, %93, %99 : vector<8x128xi1>, vector<8x128xf32>
      %c0_61 = arith.constant 0 : index
      %c0_62 = arith.constant 0 : index
      %103 = vector.load %arg13[%c0_61, %c0_62] : memref<8x256xf32, #tpu.memory_space<vmem>>, vector<8x128xf32>
      tpu.vector_store %arg13[%c0_61, %c0_62], %102 {strides = array<i32>} : memref<8x256xf32, #tpu.memory_space<vmem>>, vector<8x128xf32>,
      %c0_63 = arith.constant 0 : index
      %c0_64 = arith.constant 0 : index
      %104 = vector.load %arg13[%c0_63, %c0_64] : memref<8x256xf32, #tpu.memory_space<vmem>>, vector<8x256xf32>
      %c0_65 = arith.constant 0 : index
      %c0_66 = arith.constant 0 : index
      %105 = vector.load %arg6[%c0_65, %c0_66] : memref<256x512xf32, #tpu.memory_space<vmem>>, vector<256x512xf32>
      %cst_67 = arith.constant dense<0.000000e+00> : vector<8x512xf32>
      %106 = tpu.matmul %104, %105, %cst_67 {dimension_numbers = #tpu.dot_dimension_numbers<[1], [0], [0], [1], [0, 0, 1, 1], [], []>} : vector<8x256xf32>, vector<256x512xf32>, vector<8x512xf32> -> vector<8x512xf32>
      %c0_68 = arith.constant 0 : index
      %c0_69 = arith.constant 0 : index
      %107 = vector.load %arg7[%c0_68, %c0_69] : memref<1x512xf32, #tpu.memory_space<vmem>>, vector<1x512xf32>
      %108 = vector.broadcast %107 : vector<1x512xf32> to vector<8x512xf32>
      %109 = arith.addf %106, %108 : vector<8x512xf32>
      %110 = vector.extract_strided_slice %109 {offsets = [0, 0], sizes = [8, 128], strides = [1, 1]} : vector<8x512xf32> to vector<8x128xf32>
      %cst_70 = arith.constant 5.000000e-01 : f32
      %111 = vector.broadcast %cst_70 : f32 to vector<8x128xf32>
      %112 = arith.mulf %111, %110 : vector<8x128xf32>
      %113 = math.tanh %112 : vector<8x128xf32>
      %cst_71 = arith.constant 5.000000e-01 : f32
      %114 = vector.broadcast %cst_71 : f32 to vector<8x128xf32>
      %115 = arith.mulf %114, %113 : vector<8x128xf32>
      %cst_72 = arith.constant 5.000000e-01 : f32
      %116 = vector.broadcast %cst_72 : f32 to vector<8x128xf32>
      %117 = arith.addf %115, %116 : vector<8x128xf32>
      %118 = vector.extract_strided_slice %109 {offsets = [0, 128], sizes = [8, 128], strides = [1, 1]} : vector<8x512xf32> to vector<8x128xf32>
      %cst_73 = arith.constant 5.000000e-01 : f32
      %119 = vector.broadcast %cst_73 : f32 to vector<8x128xf32>
      %120 = arith.mulf %119, %118 : vector<8x128xf32>
      %121 = math.tanh %120 : vector<8x128xf32>
      %cst_74 = arith.constant 5.000000e-01 : f32
      %122 = vector.broadcast %cst_74 : f32 to vector<8x128xf32>
      %123 = arith.mulf %122, %121 : vector<8x128xf32>
      %cst_75 = arith.constant 5.000000e-01 : f32
      %124 = vector.broadcast %cst_75 : f32 to vector<8x128xf32>
      %125 = arith.addf %123, %124 : vector<8x128xf32>
      %126 = vector.extract_strided_slice %109 {offsets = [0, 256], sizes = [8, 128], strides = [1, 1]} : vector<8x512xf32> to vector<8x128xf32>
      %127 = math.tanh %126 : vector<8x128xf32>
      %128 = vector.extract_strided_slice %109 {offsets = [0, 384], sizes = [8, 128], strides = [1, 1]} : vector<8x512xf32> to vector<8x128xf32>
      %cst_76 = arith.constant 5.000000e-01 : f32
      %129 = vector.broadcast %cst_76 : f32 to vector<8x128xf32>
      %130 = arith.mulf %129, %128 : vector<8x128xf32>
      %131 = math.tanh %130 : vector<8x128xf32>
      %cst_77 = arith.constant 5.000000e-01 : f32
      %132 = vector.broadcast %cst_77 : f32 to vector<8x128xf32>
      %133 = arith.mulf %132, %131 : vector<8x128xf32>
      %cst_78 = arith.constant 5.000000e-01 : f32
      %134 = vector.broadcast %cst_78 : f32 to vector<8x128xf32>
      %135 = arith.addf %133, %134 : vector<8x128xf32>
      %c0_79 = arith.constant 0 : index
      %c0_80 = arith.constant 0 : index
      %136 = vector.load %arg15[%c0_79, %c0_80] : memref<8x128xf32, #tpu.memory_space<vmem>>, vector<8x128xf32>
      %137 = arith.mulf %125, %136 : vector<8x128xf32>
      %138 = arith.mulf %117, %127 : vector<8x128xf32>
      %139 = arith.addf %137, %138 : vector<8x128xf32>
      %140 = math.tanh %139 : vector<8x128xf32>
      %141 = arith.mulf %135, %140 : vector<8x128xf32>
      %c0_81 = arith.constant 0 : index
      %c0_82 = arith.constant 0 : index
      %142 = vector.load %arg15[%c0_81, %c0_82] : memref<8x128xf32, #tpu.memory_space<vmem>>, vector<8x128xf32>
      %143 = vector.shape_cast %54 : vector<8x1xi1> to vector<8x1xi1>
      %144 = vector.broadcast %143 : vector<8x1xi1> to vector<8x128xi1>
      %145 = arith.select %144, %139, %142 : vector<8x128xi1>, vector<8x128xf32>
      %c0_83 = arith.constant 0 : index
      %c0_84 = arith.constant 0 : index
      %146 = vector.load %arg15[%c0_83, %c0_84] : memref<8x128xf32, #tpu.memory_space<vmem>>, vector<8x128xf32>
      tpu.vector_store %arg15[%c0_83, %c0_84], %145 {strides = array<i32>} : memref<8x128xf32, #tpu.memory_space<vmem>>, vector<8x128xf32>,
      %c0_85 = arith.constant 0 : index
      %c128_86 = arith.constant 128 : index
      %147 = vector.load %arg13[%c0_85, %c128_86] : memref<8x256xf32, #tpu.memory_space<vmem>>, vector<8x128xf32>
      %148 = vector.shape_cast %54 : vector<8x1xi1> to vector<8x1xi1>
      %149 = vector.broadcast %148 : vector<8x1xi1> to vector<8x128xi1>
      %150 = arith.select %149, %141, %147 : vector<8x128xi1>, vector<8x128xf32>
      %c0_87 = arith.constant 0 : index
      %c128_88 = arith.constant 128 : index
      %151 = vector.load %arg13[%c0_87, %c128_88] : memref<8x256xf32, #tpu.memory_space<vmem>>, vector<8x128xf32>
      tpu.vector_store %arg13[%c0_87, %c128_88], %150 {strides = array<i32>} : memref<8x256xf32, #tpu.memory_space<vmem>>, vector<8x128xf32>,
    }
    %c0_15 = arith.constant 0 : index
    %c128 = arith.constant 128 : index
    %17 = vector.load %arg13[%c0_15, %c128] : memref<8x256xf32, #tpu.memory_space<vmem>>, vector<8x128xf32>
    %c0_16 = arith.constant 0 : index
    %c0_17 = arith.constant 0 : index
    %18 = vector.load %arg4[%c0_16, %c0_17] : memref<8x1xf32, #tpu.memory_space<vmem>>, vector<8x1xf32>
    %19 = vector.broadcast %18 : vector<8x1xf32> to vector<8x128xf32>
    %20 = arith.mulf %17, %19 : vector<8x128xf32>
    %cst_18 = arith.constant 0.000000e+00 : f32
    %21 = vector.broadcast %cst_18 : f32 to vector<8x128xf32>
    %22 = arith.maximumf %20, %21 : vector<8x128xf32>
    %c0_19 = arith.constant 0 : index
    %c0_20 = arith.constant 0 : index
    %23 = vector.load %arg8[%c0_19, %c0_20] : memref<128x128xf32, #tpu.memory_space<vmem>>, vector<128x128xf32>
    %cst_21 = arith.constant dense<0.000000e+00> : vector<8x128xf32>
    %24 = tpu.matmul %22, %23, %cst_21 {dimension_numbers = #tpu.dot_dimension_numbers<[1], [0], [0], [1], [0, 0, 1, 1], [], []>} : vector<8x128xf32>, vector<128x128xf32>, vector<8x128xf32> -> vector<8x128xf32>
    %c0_22 = arith.constant 0 : index
    %c0_23 = arith.constant 0 : index
    %25 = vector.load %arg9[%c0_22, %c0_23] : memref<1x128xf32, #tpu.memory_space<vmem>>, vector<1x128xf32>
    %26 = vector.broadcast %25 : vector<1x128xf32> to vector<8x128xf32>
    %27 = arith.addf %24, %26 : vector<8x128xf32>
    %cst_24 = arith.constant dense<0xFF800000> : vector<8xf32>
    %28 = vector.multi_reduction <maximumf>, %27, %cst_24 [1] : vector<8x128xf32> to vector<8xf32>
    %29 = vector.shape_cast %28 : vector<8xf32> to vector<8x1xf32>
    %30 = vector.broadcast %29 : vector<8x1xf32> to vector<8x128xf32>
    %31 = arith.subf %27, %30 : vector<8x128xf32>
    %32 = math.exp %31 : vector<8x128xf32>
    %cst_25 = arith.constant dense<0.000000e+00> : vector<8xf32>
    %33 = vector.multi_reduction <add>, %32, %cst_25 [1] : vector<8x128xf32> to vector<8xf32>
    %34 = vector.shape_cast %33 : vector<8xf32> to vector<8x1xf32>
    %35 = math.log %34 : vector<8x1xf32>
    %36 = vector.broadcast %35 : vector<8x1xf32> to vector<8x128xf32>
    %37 = arith.subf %31, %36 : vector<8x128xf32>
    %c0_26 = arith.constant 0 : index
    %c0_27 = arith.constant 0 : index
    %38 = vector.load %arg10[%c0_26, %c0_27] : memref<8x128xf32, #tpu.memory_space<vmem>>, vector<8x128xf32>
    tpu.vector_store %arg10[%c0_26, %c0_27], %37 {strides = array<i32>} : memref<8x128xf32, #tpu.memory_space<vmem>>, vector<8x128xf32>,
    return
  }
  func.func @transform_1(%arg0: i32, %arg1: memref<1xi32, #tpu.memory_space<smem>>) -> (i32, i32) {
    %c0_i32 = arith.constant 0 : i32
    %c0_i32_0 = arith.constant 0 : i32
    return %arg0, %c0_i32 : i32, i32
  }
  func.func @transform_2(%arg0: i32, %arg1: memref<1xi32, #tpu.memory_space<smem>>) -> (i32, i32) {
    %c0_i32 = arith.constant 0 : i32
    %c0_i32_0 = arith.constant 0 : i32
    return %arg0, %c0_i32 : i32, i32
  }
  func.func @transform_3(%arg0: i32, %arg1: memref<1xi32, #tpu.memory_space<smem>>) -> (i32, i32) {
    %c0_i32 = arith.constant 0 : i32
    %c0_i32_0 = arith.constant 0 : i32
    %c0_i32_1 = arith.constant 0 : i32
    return %c0_i32, %c0_i32_0 : i32, i32
  }
  func.func @transform_4(%arg0: i32, %arg1: memref<1xi32, #tpu.memory_space<smem>>) -> (i32, i32) {
    %c0_i32 = arith.constant 0 : i32
    %c0_i32_0 = arith.constant 0 : i32
    %c0_i32_1 = arith.constant 0 : i32
    return %c0_i32, %c0_i32_0 : i32, i32
  }
  func.func @transform_5(%arg0: i32, %arg1: memref<1xi32, #tpu.memory_space<smem>>) -> (i32, i32) {
    %c0_i32 = arith.constant 0 : i32
    %c0_i32_0 = arith.constant 0 : i32
    %c0_i32_1 = arith.constant 0 : i32
    return %c0_i32, %c0_i32_0 : i32, i32
  }
  func.func @transform_6(%arg0: i32, %arg1: memref<1xi32, #tpu.memory_space<smem>>) -> (i32, i32) {
    %c0_i32 = arith.constant 0 : i32
    %c0_i32_0 = arith.constant 0 : i32
    %c0_i32_1 = arith.constant 0 : i32
    return %c0_i32, %c0_i32_0 : i32, i32
  }
  func.func @transform_7(%arg0: i32, %arg1: memref<1xi32, #tpu.memory_space<smem>>) -> (i32, i32) {
    %c0_i32 = arith.constant 0 : i32
    %c0_i32_0 = arith.constant 0 : i32
    %c0_i32_1 = arith.constant 0 : i32
    return %c0_i32, %c0_i32_0 : i32, i32
  }
  func.func @transform_8(%arg0: i32, %arg1: memref<1xi32, #tpu.memory_space<smem>>) -> (i32, i32) {
    %c0_i32 = arith.constant 0 : i32
    %c0_i32_0 = arith.constant 0 : i32
    return %arg0, %c0_i32 : i32, i32
  }
}

</mosaic_0001>

<bundles_post_ra>
// kernel: lstm_net_forward.1
= control target key start
LH: loop header
LB: loop body
LE: loop exit
PB: predicated region body
PF: predicated region fallthrough
CT: control target
= control target key end

     0   :  { %s1812_s0 = inlined_call_operand.<no memory space> [shape: s32[1], index: 0, kind: input, shape index: {}]   ;;  %s1813_s1 = inlined_call_operand.vmem [shape: f32[8,1,8,512], index: 1, kind: input, shape index: {}]   ;;  %s1814_s2 = inlined_call_operand.vmem [shape: s32[8,1], index: 2, kind: input, shape index: {}]   ;;  %s1815_s3 = inlined_call_operand.vmem [shape: f32[8,1], index: 3, kind: input, shape index: {}]   ;;  %s1816_s4 = inlined_call_operand.vmem [shape: f32[128,512], index: 4, kind: input, shape index: {}]   ;;  %s1817_s5 = inlined_call_operand.vmem [shape: f32[256,512], index: 5, kind: input, shape index: {}]   ;;  %s1818_s6 = inlined_call_operand.vmem [shape: f32[1,512], index: 6, kind: input, shape index: {}]   ;;  %s1819_s7 = inlined_call_operand.vmem [shape: f32[128,128], index: 7, kind: input, shape index: {}]   ;;  %s1820_s8 = inlined_call_operand.vmem [shape: f32[1,128], index: 8, kind: input, shape index: {}]   ;;  %s1821_s9 = inlined_call_operand.vmem [shape: f32[8,128], index: 9, kind: output, shape index: {}]  }
   0x1   :  { %p895_p0 = scmp.le.s32.totalorder %s1812_s0, 0 }
   0x3   :  { %33 = sbr.rel (%p895_p0) target bundleno = 12 (0xc), region = 33 }
   0x8   :  { %v70_v0 = vld [vmem:[%s1813_s1] sm:$0xff]  ;;  %v72_v1 = vld [vmem:[%s1813_s1 + $0x8] sm:$0xff]  ;;  %v74_v2 = vld [vmem:[%s1813_s1 + $0x10] sm:$0xff] }
   0x9   :  { %71 = vst [vmem:[#allocation2] sm:$0xff] %v70_v0  ;;  %73 = vst [vmem:[#allocation2 + $0x8] sm:$0xff] %v72_v1  ;;  %v76_v3 = vld [vmem:[%s1813_s1 + $0x18] sm:$0xff] }
   0xa   :  { %75 = vst [vmem:[#allocation2 + $0x10] sm:$0xff] %v74_v2  ;;  %77 = vst [vmem:[#allocation2 + $0x18] sm:$0xff] %v76_v3 }
   0xb   :  { %85 = vsyncadd [#allocation3], 512 }
   0xc PF:  { %v1016_v4 = vmov 0.0   ;;  %892 = sbr.rel (%p895_p0) target bundleno = 543 (0x21f), region = 148  ;;  %s1098_s23 = smov (!%p895_p0), 0  }
   0xd   :  { %86 = vst [vmem:[#allocation4] sm:$0xff] %v1016_v4  ;;  %87 = vst [vmem:[#allocation4 + $0x8] sm:$0xff] %v1016_v4 }
   0xe   :  { %88 = vst [vmem:[#allocation5] sm:$0xff] %v1016_v4  ;;  %89 = vst [vmem:[#allocation6] sm:$0xff] %v1016_v4 }
  0x11 LB: > { %s96_s24 = sand.u32 1, %s1014_s23  ;;  %s97_s25 = sadd.s32 1, %s1014_s23   ;;  %s1014_s23 = sphi %s1098_s23, %s1823_s23  }
  0x12   : > { %p1110_p1 = scmp.ge.s32.totalorder %s97_s25, %s1812_s0 }
  0x13   : > { %s102_s29 = ssub.s32 (!%p1110_p1), 1, %s96_s24  ;;  %s912_s30 = sshll.u32 (!%p1110_p1), %s1014_s23, 5 }
  0x14   : > { %101 = sbr.rel (%p1110_p1) target bundleno = 29 (0x1d), region = 78  ;;  %s866_s12 = scalar_lea.vmem (!%p1110_p1), %s1813_s1, %s912_s30 }
  0x15   : > { %s913_s13 = sshll.u32 (!%p1110_p1), %s102_s29, 5  ;;  %s111_s15 = scalar_lea.sflag (!%p1110_p1), [#allocation3], %s102_s29 }
  0x16   : > { %s110_s14 = scalar_lea.vmem (!%p1110_p1), [#allocation2], %s913_s13 }
  0x19   : > { %v902_v5 = vld [vmem:[%s866_s12 + $0x20] sm:$0xff]  ;;  %v903_v6 = vld [vmem:[%s866_s12 + $0x28] sm:$0xff]  ;;  %v904_v7 = vld [vmem:[%s866_s12 + $0x30] sm:$0xff] }
  0x1a   : > { %146 = vst [vmem:[%s110_s14] sm:$0xff] %v902_v5  ;;  %148 = vst [vmem:[%s110_s14 + $0x8] sm:$0xff] %v903_v6  ;;  %v905_v8 = vld [vmem:[%s866_s12 + $0x38] sm:$0xff] }
  0x1b   : > { %150 = vst [vmem:[%s110_s14 + $0x10] sm:$0xff] %v904_v7  ;;  %152 = vst [vmem:[%s110_s14 + $0x18] sm:$0xff] %v905_v8 }
  0x1c   : > { %160 = vsyncadd %s111_s15, 512 }
  0x1d PF: > { %s914_s16 = sshll.u32 %s96_s24, 5  ;;  %s164_s18 = scalar_lea.sflag [#allocation3], %s96_s24 }
  0x1e   : > { %s1120_s17 = scalar_lea.vmem [#allocation2], %s914_s16 }
  0x1f   : > { %1010 = dma.done.wait %s164_s18, 512 }
  0x20   : > { %1011 = vsyncadd %s164_s18, 4294966784  ;;  %v1017_v9 = vmov 0.0   ;;  %v1018_v10 = vmov 0   ;;  %v238_v11 = vld [vmem:[%s1816_s4 + $0x1e8] sm:$0xff]  ;;  %v237_v12 = vld [vmem:[%s1816_s4 + $0x1e0] sm:$0xff]  ;;  %v170_v2 = vstv %s1014_s23  ;;  %s1823_s23 = smov %s97_s25 }
  0x21   : > { %305 = vmatprep.mubr.f32.mxu0 %v1017_v9  ;;  %376 = vmatprep.mubr.f32.mxu1 %v1017_v9  ;;  %v234_v13 = vld [vmem:[%s1816_s4 + $0x1c8] sm:$0xff]  ;;  %v233_v14 = vld [vmem:[%s1816_s4 + $0x1c0] sm:$0xff]  ;;  %v240_v16 = vld [vmem:[%s1816_s4 + $0x1f8] sm:$0xff] }
  0x22   : > { %980 = vset.pattern.permute.xlu0 %v1018_v10  ;;  %241 = vmatprep.subr.mxu0 %v238_v11  ;;  %v230_v15 = vld [vmem:[%s1816_s4 + $0x1a8] sm:$0xff]  ;;  %v229_v17 = vld [vmem:[%s1816_s4 + $0x1a0] sm:$0xff]  ;;  %v239_v18 = vld [vmem:[%s1816_s4 + $0x1f0] sm:$0xff] }
  0x23   : > { %242 = vmatpush1.msra.mxu0 %v237_v12  ;;  %312 = vmatprep.subr.mxu1 %v240_v16  ;;  %v236_v19 = vld [vmem:[%s1816_s4 + $0x1d8] sm:$0xff]  ;;  %v226_v20 = vld [vmem:[%s1816_s4 + $0x188] sm:$0xff]  ;;  %v235_v21 = vld [vmem:[%s1816_s4 + $0x1d0] sm:$0xff] }
  0x24   : > { %243 = vmatprep.subr.mxu0 %v234_v13  ;;  %313 = vmatpush1.msra.mxu1 %v239_v18  ;;  %v225_v22 = vld [vmem:[%s1816_s4 + $0x180] sm:$0xff]  ;;  %v232_v23 = vld [vmem:[%s1816_s4 + $0x1b8] sm:$0xff]  ;;  %v231_v24 = vld [vmem:[%s1816_s4 + $0x1b0] sm:$0xff] }
  0x25   : > { %244 = vmatpush1.msra.mxu0 %v233_v14  ;;  %314 = vmatprep.subr.mxu1 %v236_v19  ;;  %v222_v25 = vld [vmem:[%s1816_s4 + $0x168] sm:$0xff]  ;;  %v228_v26 = vld [vmem:[%s1816_s4 + $0x198] sm:$0xff]  ;;  %v221_v27 = vld [vmem:[%s1816_s4 + $0x160] sm:$0xff] }
  0x26   : > { %245 = vmatprep.subr.mxu0 %v230_v15  ;;  %315 = vmatpush1.msra.mxu1 %v235_v21  ;;  %v227_v28 = vld [vmem:[%s1816_s4 + $0x190] sm:$0xff]  ;;  %v218_v29 = vld [vmem:[%s1816_s4 + $0x148] sm:$0xff]  ;;  %v224_v30 = vld [vmem:[%s1816_s4 + $0x178] sm:$0xff] }
  0x27   : > { %246 = vmatpush1.msra.mxu0 %v229_v17  ;;  %316 = vmatprep.subr.mxu1 %v232_v23  ;;  %v217_v31 = vld [vmem:[%s1816_s4 + $0x140] sm:$0xff]  ;;  %v223_v32 = vld [vmem:[%s1816_s4 + $0x170] sm:$0xff]  ;;  %v214_v33 = vld [vmem:[%s1816_s4 + $0x128] sm:$0xff] }
  0x28   : > { %247 = vmatprep.subr.mxu0 %v226_v20  ;;  %317 = vmatpush1.msra.mxu1 %v231_v24  ;;  %v220_v34 = vld [vmem:[%s1816_s4 + $0x158] sm:$0xff]  ;;  %v213_v35 = vld [vmem:[%s1816_s4 + $0x120] sm:$0xff]  ;;  %v219_v36 = vld [vmem:[%s1816_s4 + $0x150] sm:$0xff] }
  0x29   : > { %248 = vmatpush1.msra.mxu0 %v225_v22  ;;  %318 = vmatprep.subr.mxu1 %v228_v26  ;;  %v210_v37 = vld [vmem:[%s1816_s4 + $0x108] sm:$0xff]  ;;  %v216_v38 = vld [vmem:[%s1816_s4 + $0x138] sm:$0xff]  ;;  %v209_v39 = vld [vmem:[%s1816_s4 + $0x100] sm:$0xff] }
  0x2a   : > { %249 = vmatprep.subr.mxu0 %v222_v25  ;;  %319 = vmatpush1.msra.mxu1 %v227_v28  ;;  %v215_v40 = vld [vmem:[%s1816_s4 + $0x130] sm:$0xff]  ;;  %v206_v41 = vld [vmem:[%s1816_s4 + $0xe8] sm:$0xff]  ;;  %v212_v42 = vld [vmem:[%s1816_s4 + $0x118] sm:$0xff] }
  0x2b   : > { %250 = vmatpush1.msra.mxu0 %v221_v27  ;;  %320 = vmatprep.subr.mxu1 %v224_v30  ;;  %v205_v43 = vld [vmem:[%s1816_s4 + $0xe0] sm:$0xff]  ;;  %v211_v44 = vld [vmem:[%s1816_s4 + $0x110] sm:$0xff]  ;;  %v202_v45 = vld [vmem:[%s1816_s4 + $0xc8] sm:$0xff] }
  0x2c   : > { %251 = vmatprep.subr.mxu0 %v218_v29  ;;  %321 = vmatpush1.msra.mxu1 %v223_v32  ;;  %v208_v46 = vld [vmem:[%s1816_s4 + $0xf8] sm:$0xff]  ;;  %v201_v47 = vld [vmem:[%s1816_s4 + $0xc0] sm:$0xff]  ;;  %v207_v48 = vld [vmem:[%s1816_s4 + $0xf0] sm:$0xff] }
  0x2d   : > { %252 = vmatpush1.msra.mxu0 %v217_v31  ;;  %322 = vmatprep.subr.mxu1 %v220_v34  ;;  %v198_v49 = vld [vmem:[%s1816_s4 + $0xa8] sm:$0xff]  ;;  %v204_v50 = vld [vmem:[%s1816_s4 + $0xd8] sm:$0xff]  ;;  %v197_v51 = vld [vmem:[%s1816_s4 + $0xa0] sm:$0xff] }
  0x2e   : > { %253 = vmatprep.subr.mxu0 %v214_v33  ;;  %323 = vmatpush1.msra.mxu1 %v219_v36  ;;  %v203_v52 = vld [vmem:[%s1816_s4 + $0xd0] sm:$0xff]  ;;  %v194_v53 = vld [vmem:[%s1816_s4 + $0x88] sm:$0xff]  ;;  %v200_v54 = vld [vmem:[%s1816_s4 + $0xb8] sm:$0xff] }
  0x2f   : > { %254 = vmatpush1.msra.mxu0 %v213_v35  ;;  %324 = vmatprep.subr.mxu1 %v216_v38  ;;  %v193_v55 = vld [vmem:[%s1816_s4 + $0x80] sm:$0xff]  ;;  %v199_v56 = vld [vmem:[%s1816_s4 + $0xb0] sm:$0xff]  ;;  %v190_v57 = vld [vmem:[%s1816_s4 + $0x68] sm:$0xff] }
  0x30   : > { %255 = vmatprep.subr.mxu0 %v210_v37  ;;  %325 = vmatpush1.msra.mxu1 %v215_v40  ;;  %v196_v58 = vld [vmem:[%s1816_s4 + $0x98] sm:$0xff]  ;;  %v189_v59 = vld [vmem:[%s1816_s4 + $0x60] sm:$0xff]  ;;  %v195_v60 = vld [vmem:[%s1816_s4 + $0x90] sm:$0xff] }
  0x31   : > { %256 = vmatpush1.msra.mxu0 %v209_v39  ;;  %326 = vmatprep.subr.mxu1 %v212_v42  ;;  %v186_v61 = vld [vmem:[%s1816_s4 + $0x48] sm:$0xff]  ;;  %v192_v62 = vld [vmem:[%s1816_s4 + $0x78] sm:$0xff]  ;;  %v185_v63 = vld [vmem:[%s1816_s4 + $0x40] sm:$0xff] }
  0x32   : > { %257 = vmatprep.subr.mxu0 %v206_v41  ;;  %327 = vmatpush1.msra.mxu1 %v211_v44  ;;  %v191_v0 = vld [vmem:[%s1816_s4 + $0x70] sm:$0xff]  ;;  %v169_v1 = vld [vmem:[%s1814_s2] sm:$0xff]  ;;  %v182_v3 = vld [vmem:[%s1816_s4 + $0x28] sm:$0xff] }
  0x33   : > { %258 = vmatpush1.msra.mxu0 %v205_v43  ;;  %328 = vmatprep.subr.mxu1 %v208_v46  ;;  %v188_v5 = vld [vmem:[%s1816_s4 + $0x58] sm:$0xff]  ;;  %v181_v6 = vld [vmem:[%s1816_s4 + $0x20] sm:$0xff]  ;;  %v187_v7 = vld [vmem:[%s1816_s4 + $0x50] sm:$0xff]  ;;  %vm171_vm0 = vcmp.gt.s32.totalorder %v169_v1, %v170_v2 }
  0x34   : > { %259 = vmatprep.subr.mxu0 %v202_v45  ;;  %329 = vmatpush1.msra.mxu1 %v207_v48  ;;  %v178_v8 = vld [vmem:[%s1816_s4 + $0x8] sm:$0xff]  ;;  %v184_v9 = vld [vmem:[%s1816_s4 + $0x38] sm:$0xff]  ;;  %v177_v11 = vld [vmem:[%s1816_s4] sm:$0xff]  ;;  %v406_v16 = vsel %vm171_vm0, 1, %v1018_v10 }
  0x35   : > { %260 = vmatpush1.msra.mxu0 %v201_v47  ;;  %330 = vmatprep.subr.mxu1 %v204_v50  ;;  %v183_v12 = vld [vmem:[%s1816_s4 + $0x30] sm:$0xff]  ;;  %v1313_v13 = vld [vmem:[#allocation4] sm:$0xff]  ;;  %v180_v14 = vld [vmem:[%s1816_s4 + $0x18] sm:$0xff] }
  0x36   : > { %261 = vmatprep.subr.mxu0 %v198_v49  ;;  %331 = vmatpush1.msra.mxu1 %v203_v52  ;;  %v179_v15 = vld [vmem:[%s1816_s4 + $0x10] sm:$0xff]  ;;  %v479_v17 = vld [vmem:[%s1817_s5 + $0x1e8] sm:$0xff]  ;;  %v481_v18 = vld [vmem:[%s1817_s5 + $0x1f8] sm:$0xff] }
  0x37   : > { %262 = vmatpush1.msra.mxu0 %v197_v51  ;;  %332 = vmatprep.subr.mxu1 %v200_v54  ;;  %v478_v19 = vld [vmem:[%s1817_s5 + $0x1e0] sm:$0xff]  ;;  %v480_v10 = vld [vmem:[%s1817_s5 + $0x1f0] sm:$0xff]  ;;  %v475_v20 = vld [vmem:[%s1817_s5 + $0x1c8] sm:$0xff] }
  0x38   : > { %263 = vmatprep.subr.mxu0 %v194_v53  ;;  %333 = vmatpush1.msra.mxu1 %v199_v56  ;;  %v477_v21 = vld [vmem:[%s1817_s5 + $0x1d8] sm:$0xff]  ;;  %v474_v22 = vld [vmem:[%s1817_s5 + $0x1c0] sm:$0xff]  ;;  %v476_v23 = vld [vmem:[%s1817_s5 + $0x1d0] sm:$0xff] }
  0x39   : > { %264 = vmatpush1.msra.mxu0 %v193_v55  ;;  %334 = vmatprep.subr.mxu1 %v196_v58  ;;  %v471_v24 = vld [vmem:[%s1817_s5 + $0x1a8] sm:$0xff]  ;;  %v473_v25 = vld [vmem:[%s1817_s5 + $0x1b8] sm:$0xff]  ;;  %v470_v26 = vld [vmem:[%s1817_s5 + $0x1a0] sm:$0xff] }
  0x3a   : > { %265 = vmatprep.subr.mxu0 %v190_v57  ;;  %335 = vmatpush1.msra.mxu1 %v195_v60  ;;  %v472_v27 = vld [vmem:[%s1817_s5 + $0x1b0] sm:$0xff]  ;;  %v467_v28 = vld [vmem:[%s1817_s5 + $0x188] sm:$0xff]  ;;  %v469_v29 = vld [vmem:[%s1817_s5 + $0x198] sm:$0xff] }
  0x3b   : > { %266 = vmatpush1.msra.mxu0 %v189_v59  ;;  %336 = vmatprep.subr.mxu1 %v192_v62  ;;  %v466_v30 = vld [vmem:[%s1817_s5 + $0x180] sm:$0xff]  ;;  %v468_v31 = vld [vmem:[%s1817_s5 + $0x190] sm:$0xff]  ;;  %v463_v32 = vld [vmem:[%s1817_s5 + $0x168] sm:$0xff] }
  0x3c   : > { %267 = vmatprep.subr.mxu0 %v186_v61  ;;  %337 = vmatpush1.msra.mxu1 %v191_v0  ;;  %v465_v33 = vld [vmem:[%s1817_s5 + $0x178] sm:$0xff]  ;;  %v462_v34 = vld [vmem:[%s1817_s5 + $0x160] sm:$0xff]  ;;  %v464_v35 = vld [vmem:[%s1817_s5 + $0x170] sm:$0xff] }
  0x3d   : > { %268 = vmatpush1.msra.mxu0 %v185_v63  ;;  %338 = vmatprep.subr.mxu1 %v188_v5  ;;  %v459_v36 = vld [vmem:[%s1817_s5 + $0x148] sm:$0xff]  ;;  %v461_v37 = vld [vmem:[%s1817_s5 + $0x158] sm:$0xff]  ;;  %v458_v38 = vld [vmem:[%s1817_s5 + $0x140] sm:$0xff] }
  0x3e   : > { %269 = vmatprep.subr.mxu0 %v182_v3  ;;  %339 = vmatpush1.msra.mxu1 %v187_v7  ;;  %v460_v39 = vld [vmem:[%s1817_s5 + $0x150] sm:$0xff]  ;;  %v455_v40 = vld [vmem:[%s1817_s5 + $0x128] sm:$0xff]  ;;  %v457_v41 = vld [vmem:[%s1817_s5 + $0x138] sm:$0xff] }
  0x3f   : > { %270 = vmatpush1.msra.mxu0 %v181_v6  ;;  %340 = vmatprep.subr.mxu1 %v184_v9  ;;  %v454_v42 = vld [vmem:[%s1817_s5 + $0x120] sm:$0xff]  ;;  %v456_v43 = vld [vmem:[%s1817_s5 + $0x130] sm:$0xff]  ;;  %v451_v44 = vld [vmem:[%s1817_s5 + $0x108] sm:$0xff] }
  0x40   : > { %271 = vmatprep.subr.mxu0 %v178_v8  ;;  %341 = vmatpush1.msra.mxu1 %v183_v12  ;;  %v453_v45 = vld [vmem:[%s1817_s5 + $0x118] sm:$0xff]  ;;  %v450_v46 = vld [vmem:[%s1817_s5 + $0x100] sm:$0xff]  ;;  %v452_v47 = vld [vmem:[%s1817_s5 + $0x110] sm:$0xff] }
  0x41   : > { %272 = vmatpush1.msra.mxu0 %v177_v11  ;;  %342 = vmatprep.subr.mxu1 %v180_v14  ;;  %v447_v48 = vld [vmem:[%s1817_s5 + $0xe8] sm:$0xff]  ;;  %v449_v49 = vld [vmem:[%s1817_s5 + $0xf8] sm:$0xff]  ;;  %v446_v50 = vld [vmem:[%s1817_s5 + $0xe0] sm:$0xff] }
  0x42   : > { %306 = vmatmul.mubr.f32.vlgmr.msra.gmra.mxu0 %v1313_v13  ;;  %343 = vmatpush1.msra.mxu1 %v179_v15  ;;  %v448_v51 = vld [vmem:[%s1817_s5 + $0xf0] sm:$0xff]  ;;  %v443_v52 = vld [vmem:[%s1817_s5 + $0xc8] sm:$0xff]  ;;  %v445_v53 = vld [vmem:[%s1817_s5 + $0xd8] sm:$0xff] }
  0x43   : > { %408 = vperm.xlu0 %980, %v406_v16   ;;  %377 = vmatmul.mubr.f32.vlgmr.msra.gmra.mxu1 %v1313_v13  ;;  %v442_v54 = vld [vmem:[%s1817_s5 + $0xc0] sm:$0xff]  ;;  %v444_v55 = vld [vmem:[%s1817_s5 + $0xd0] sm:$0xff]  ;;  %v439_v56 = vld [vmem:[%s1817_s5 + $0xa8] sm:$0xff] }
  0x44   : > { %568 = vmatprep.subr.mxu0 %v479_v17  ;;  %639 = vmatprep.subr.mxu1 %v481_v18  ;;  %v441_v57 = vld [vmem:[%s1817_s5 + $0xb8] sm:$0xff]  ;;  %v438_v58 = vld [vmem:[%s1817_s5 + $0xa0] sm:$0xff]  ;;  %v440_v59 = vld [vmem:[%s1817_s5 + $0xb0] sm:$0xff] }
  0x45   : > { %569 = vmatpush1.msra.mxu0 %v478_v19  ;;  %640 = vmatpush1.msra.mxu1 %v480_v10  ;;  %v435_v60 = vld [vmem:[%s1817_s5 + $0x88] sm:$0xff]  ;;  %v437_v61 = vld [vmem:[%s1817_s5 + $0x98] sm:$0xff]  ;;  %v434_v62 = vld [vmem:[%s1817_s5 + $0x80] sm:$0xff] }
  0x46   : > { %570 = vmatprep.subr.mxu0 %v475_v20  ;;  %641 = vmatprep.subr.mxu1 %v477_v21  ;;  %v436_v63 = vld [vmem:[%s1817_s5 + $0x90] sm:$0xff]  ;;  %v431_v0 = vld [vmem:[%s1817_s5 + $0x68] sm:$0xff]  ;;  %v433_v1 = vld [vmem:[%s1817_s5 + $0x78] sm:$0xff] }
  0x47   : > { %571 = vmatpush1.msra.mxu0 %v474_v22  ;;  %642 = vmatpush1.msra.mxu1 %v476_v23  ;;  %v430_v2 = vld [vmem:[%s1817_s5 + $0x60] sm:$0xff]  ;;  %v432_v3 = vld [vmem:[%s1817_s5 + $0x70] sm:$0xff]  ;;  %v427_v5 = vld [vmem:[%s1817_s5 + $0x48] sm:$0xff] }
  0x48   : > { %572 = vmatprep.subr.mxu0 %v471_v24  ;;  %643 = vmatprep.subr.mxu1 %v473_v25  ;;  %v429_v6 = vld [vmem:[%s1817_s5 + $0x58] sm:$0xff]  ;;  %v426_v7 = vld [vmem:[%s1817_s5 + $0x40] sm:$0xff]  ;;  %v428_v8 = vld [vmem:[%s1817_s5 + $0x50] sm:$0xff] }
  0x49   : > { %573 = vmatpush1.msra.mxu0 %v470_v26  ;;  %644 = vmatpush1.msra.mxu1 %v472_v27  ;;  %v423_v9 = vld [vmem:[%s1817_s5 + $0x28] sm:$0xff]  ;;  %v425_v11 = vld [vmem:[%s1817_s5 + $0x38] sm:$0xff]  ;;  %v422_v12 = vld [vmem:[%s1817_s5 + $0x20] sm:$0xff] }
  0x4a   : > { %574 = vmatprep.subr.mxu0 %v467_v28  ;;  %645 = vmatprep.subr.mxu1 %v469_v29  ;;  %v424_v14 = vld [vmem:[%s1817_s5 + $0x30] sm:$0xff]  ;;  %v419_v15 = vld [vmem:[%s1817_s5 + $0x8] sm:$0xff]  ;;  %v421_v16 = vld [vmem:[%s1817_s5 + $0x18] sm:$0xff] }
  0x4b   : > { %575 = vmatpush1.msra.mxu0 %v466_v30  ;;  %646 = vmatpush1.msra.mxu1 %v468_v31  ;;  %v418_v17 = vld [vmem:[%s1817_s5] sm:$0xff]  ;;  %v420_v18 = vld [vmem:[%s1817_s5 + $0x10] sm:$0xff]  ;;  %v543_v19 = vld [vmem:[%s1817_s5 + $0x3e8] sm:$0xff] }
  0x4c   : > { %576 = vmatprep.subr.mxu0 %v463_v32  ;;  %647 = vmatprep.subr.mxu1 %v465_v33  ;;  %v545_v10 = vld [vmem:[%s1817_s5 + $0x3f8] sm:$0xff]  ;;  %v542_v20 = vld [vmem:[%s1817_s5 + $0x3e0] sm:$0xff]  ;;  %v544_v21 = vld [vmem:[%s1817_s5 + $0x3f0] sm:$0xff] }
  0x4d   : > { %577 = vmatpush1.msra.mxu0 %v462_v34  ;;  %648 = vmatpush1.msra.mxu1 %v464_v35  ;;  %v539_v22 = vld [vmem:[%s1817_s5 + $0x3c8] sm:$0xff]  ;;  %v541_v23 = vld [vmem:[%s1817_s5 + $0x3d8] sm:$0xff]  ;;  %v538_v24 = vld [vmem:[%s1817_s5 + $0x3c0] sm:$0xff] }
  0x4e   : > { %578 = vmatprep.subr.mxu0 %v459_v36  ;;  %649 = vmatprep.subr.mxu1 %v461_v37  ;;  %v540_v25 = vld [vmem:[%s1817_s5 + $0x3d0] sm:$0xff]  ;;  %v535_v26 = vld [vmem:[%s1817_s5 + $0x3a8] sm:$0xff]  ;;  %v537_v27 = vld [vmem:[%s1817_s5 + $0x3b8] sm:$0xff] }
  0x4f   : > { %579 = vmatpush1.msra.mxu0 %v458_v38  ;;  %650 = vmatpush1.msra.mxu1 %v460_v39  ;;  %v534_v28 = vld [vmem:[%s1817_s5 + $0x3a0] sm:$0xff]  ;;  %v536_v29 = vld [vmem:[%s1817_s5 + $0x3b0] sm:$0xff]  ;;  %v531_v30 = vld [vmem:[%s1817_s5 + $0x388] sm:$0xff] }
  0x50   : > { %580 = vmatprep.subr.mxu0 %v455_v40  ;;  %651 = vmatprep.subr.mxu1 %v457_v41  ;;  %v533_v31 = vld [vmem:[%s1817_s5 + $0x398] sm:$0xff]  ;;  %v530_v32 = vld [vmem:[%s1817_s5 + $0x380] sm:$0xff]  ;;  %v532_v33 = vld [vmem:[%s1817_s5 + $0x390] sm:$0xff] }
  0x51   : > { %581 = vmatpush1.msra.mxu0 %v454_v42  ;;  %652 = vmatpush1.msra.mxu1 %v456_v43  ;;  %v527_v34 = vld [vmem:[%s1817_s5 + $0x368] sm:$0xff]  ;;  %v529_v35 = vld [vmem:[%s1817_s5 + $0x378] sm:$0xff]  ;;  %v526_v36 = vld [vmem:[%s1817_s5 + $0x360] sm:$0xff] }
  0x52   : > { %582 = vmatprep.subr.mxu0 %v451_v44  ;;  %653 = vmatprep.subr.mxu1 %v453_v45  ;;  %v528_v37 = vld [vmem:[%s1817_s5 + $0x370] sm:$0xff]  ;;  %v523_v38 = vld [vmem:[%s1817_s5 + $0x348] sm:$0xff]  ;;  %v525_v39 = vld [vmem:[%s1817_s5 + $0x358] sm:$0xff] }
  0x53   : > { %583 = vmatpush1.msra.mxu0 %v450_v46  ;;  %654 = vmatpush1.msra.mxu1 %v452_v47  ;;  %v522_v40 = vld [vmem:[%s1817_s5 + $0x340] sm:$0xff]  ;;  %v524_v41 = vld [vmem:[%s1817_s5 + $0x350] sm:$0xff]  ;;  %v519_v42 = vld [vmem:[%s1817_s5 + $0x328] sm:$0xff] }
  0x54   : > { %584 = vmatprep.subr.mxu0 %v447_v48  ;;  %655 = vmatprep.subr.mxu1 %v449_v49  ;;  %v521_v43 = vld [vmem:[%s1817_s5 + $0x338] sm:$0xff]  ;;  %v518_v44 = vld [vmem:[%s1817_s5 + $0x320] sm:$0xff]  ;;  %v520_v45 = vld [vmem:[%s1817_s5 + $0x330] sm:$0xff] }
  0x55   : > { %585 = vmatpush1.msra.mxu0 %v446_v50  ;;  %656 = vmatpush1.msra.mxu1 %v448_v51  ;;  %v515_v46 = vld [vmem:[%s1817_s5 + $0x308] sm:$0xff]  ;;  %v517_v47 = vld [vmem:[%s1817_s5 + $0x318] sm:$0xff]  ;;  %v514_v48 = vld [vmem:[%s1817_s5 + $0x300] sm:$0xff] }
  0x56   : > { %586 = vmatprep.subr.mxu0 %v443_v52  ;;  %657 = vmatprep.subr.mxu1 %v445_v53  ;;  %v516_v49 = vld [vmem:[%s1817_s5 + $0x310] sm:$0xff]  ;;  %v511_v50 = vld [vmem:[%s1817_s5 + $0x2e8] sm:$0xff]  ;;  %v513_v51 = vld [vmem:[%s1817_s5 + $0x2f8] sm:$0xff] }
  0x57   : > { %587 = vmatpush1.msra.mxu0 %v442_v54  ;;  %658 = vmatpush1.msra.mxu1 %v444_v55  ;;  %v510_v52 = vld [vmem:[%s1817_s5 + $0x2e0] sm:$0xff]  ;;  %v512_v53 = vld [vmem:[%s1817_s5 + $0x2f0] sm:$0xff]  ;;  %v507_v54 = vld [vmem:[%s1817_s5 + $0x2c8] sm:$0xff] }
  0x58   : > { %588 = vmatprep.subr.mxu0 %v439_v56  ;;  %659 = vmatprep.subr.mxu1 %v441_v57  ;;  %v509_v55 = vld [vmem:[%s1817_s5 + $0x2d8] sm:$0xff]  ;;  %v506_v56 = vld [vmem:[%s1817_s5 + $0x2c0] sm:$0xff]  ;;  %v508_v57 = vld [vmem:[%s1817_s5 + $0x2d0] sm:$0xff] }
  0x59   : > { %589 = vmatpush1.msra.mxu0 %v438_v58  ;;  %660 = vmatpush1.msra.mxu1 %v440_v59  ;;  %v503_v58 = vld [vmem:[%s1817_s5 + $0x2a8] sm:$0xff]  ;;  %v505_v59 = vld [vmem:[%s1817_s5 + $0x2b8] sm:$0xff] }
  0x5a   : > { %590 = vmatprep.subr.mxu0 %v435_v60  ;;  %661 = vmatprep.subr.mxu1 %v437_v61  ;;  %v502_v60 = vld [vmem:[%s1817_s5 + $0x2a0] sm:$0xff]  ;;  %v504_v61 = vld [vmem:[%s1817_s5 + $0x2b0] sm:$0xff] }
  0x5b   : > { %591 = vmatpush1.msra.mxu0 %v434_v62  ;;  %662 = vmatpush1.msra.mxu1 %v436_v63  ;;  %v499_v62 = vld [vmem:[%s1817_s5 + $0x288] sm:$0xff]  ;;  %v501_v63 = vld [vmem:[%s1817_s5 + $0x298] sm:$0xff] }
  0x5c   : > { %592 = vmatprep.subr.mxu0 %v431_v0  ;;  %663 = vmatprep.subr.mxu1 %v433_v1  ;;  %v498_v0 = vld [vmem:[%s1817_s5 + $0x280] sm:$0xff]  ;;  %v500_v1 = vld [vmem:[%s1817_s5 + $0x290] sm:$0xff] }
  0x5d   : > { %593 = vmatpush1.msra.mxu0 %v430_v2  ;;  %664 = vmatpush1.msra.mxu1 %v432_v3  ;;  %v495_v2 = vld [vmem:[%s1817_s5 + $0x268] sm:$0xff]  ;;  %v497_v3 = vld [vmem:[%s1817_s5 + $0x278] sm:$0xff] }
  0x5e   : > { %594 = vmatprep.subr.mxu0 %v427_v5  ;;  %665 = vmatprep.subr.mxu1 %v429_v6  ;;  %v494_v5 = vld [vmem:[%s1817_s5 + $0x260] sm:$0xff]  ;;  %v496_v6 = vld [vmem:[%s1817_s5 + $0x270] sm:$0xff] }
  0x5f   : > { %595 = vmatpush1.msra.mxu0 %v426_v7  ;;  %666 = vmatpush1.msra.mxu1 %v428_v8  ;;  %v491_v7 = vld [vmem:[%s1817_s5 + $0x248] sm:$0xff]  ;;  %v493_v8 = vld [vmem:[%s1817_s5 + $0x258] sm:$0xff] }
  0x60   : > { %596 = vmatprep.subr.mxu0 %v423_v9  ;;  %667 = vmatprep.subr.mxu1 %v425_v11  ;;  %v490_v9 = vld [vmem:[%s1817_s5 + $0x240] sm:$0xff]  ;;  %v492_v11 = vld [vmem:[%s1817_s5 + $0x250] sm:$0xff] }
  0x61   : > { %597 = vmatpush1.msra.mxu0 %v422_v12  ;;  %668 = vmatpush1.msra.mxu1 %v424_v14  ;;  %v487_v12 = vld [vmem:[%s1817_s5 + $0x228] sm:$0xff]  ;;  %v489_v14 = vld [vmem:[%s1817_s5 + $0x238] sm:$0xff] }
  0x62   : > { %598 = vmatprep.subr.mxu0 %v419_v15  ;;  %669 = vmatprep.subr.mxu1 %v421_v16  ;;  %v486_v15 = vld [vmem:[%s1817_s5 + $0x220] sm:$0xff]  ;;  %v488_v16 = vld [vmem:[%s1817_s5 + $0x230] sm:$0xff] }
  0x63   : > { %599 = vmatpush1.msra.mxu0 %v418_v17  ;;  %670 = vmatpush1.msra.mxu1 %v420_v18  ;;  %v483_v17 = vld [vmem:[%s1817_s5 + $0x208] sm:$0xff]  ;;  %v485_v18 = vld [vmem:[%s1817_s5 + $0x218] sm:$0xff] }
  0x64   : > { %600 = vmatprep.subr.mxu0 %v543_v19  ;;  %671 = vmatprep.subr.mxu1 %v545_v10  ;;  %v482_v19 = vld [vmem:[%s1817_s5 + $0x200] sm:$0xff]  ;;  %v1705_v10 = vld [vmem:[#allocation4 + $0x8] sm:$0xff] }
  0x65   : > { %601 = vmatpush2.msra.mxu0 %v542_v20  ;;  %672 = vmatpush2.msra.mxu1 %v544_v21  ;;  %v484_v20 = vld [vmem:[%s1817_s5 + $0x210] sm:$0xff]  ;;  %v172_v21 = vld [vmem:[%s1120_s17] sm:$0xff] }
  0x66   : > { %602 = vmatprep.subr.mxu0 %v539_v22  ;;  %673 = vmatprep.subr.mxu1 %v541_v23  ;;  %v173_v23 = vld [vmem:[%s1120_s17 + $0x8] sm:$0xff] }
  0x67   : > { %603 = vmatpush2.msra.mxu0 %v538_v24  ;;  %674 = vmatpush2.msra.mxu1 %v540_v25 }
  0x68   : > { %604 = vmatprep.subr.mxu0 %v535_v26  ;;  %675 = vmatprep.subr.mxu1 %v537_v27  ;;  %v174_v26 = vld [vmem:[%s1120_s17 + $0x10] sm:$0xff] }
  0x69   : > { %605 = vmatpush2.msra.mxu0 %v534_v28  ;;  %676 = vmatpush2.msra.mxu1 %v536_v29 }
  0x6a   : > { %606 = vmatprep.subr.mxu0 %v531_v30  ;;  %677 = vmatprep.subr.mxu1 %v533_v31 }
  0x6b   : > { %607 = vmatpush2.msra.mxu0 %v530_v32  ;;  %678 = vmatpush2.msra.mxu1 %v532_v33  ;;  %v175_v32 = vld [vmem:[%s1120_s17 + $0x18] sm:$0xff] }
  0x6c   : > { %608 = vmatprep.subr.mxu0 %v527_v34  ;;  %679 = vmatprep.subr.mxu1 %v529_v35 }
  0x6d   : > { %609 = vmatpush2.msra.mxu0 %v526_v36  ;;  %680 = vmatpush2.msra.mxu1 %v528_v37 }
  0x6e   : > { %610 = vmatprep.subr.mxu0 %v523_v38  ;;  %681 = vmatprep.subr.mxu1 %v525_v39 }
  0x6f   : > { %611 = vmatpush2.msra.mxu0 %v522_v40  ;;  %682 = vmatpush2.msra.mxu1 %v524_v41 }
  0x70   : > { %612 = vmatprep.subr.mxu0 %v519_v42  ;;  %683 = vmatprep.subr.mxu1 %v521_v43  ;;  %v400_v42 = vld [vmem:[#allocation5] sm:$0xff] }
  0x71   : > { %613 = vmatpush2.msra.mxu0 %v518_v44  ;;  %684 = vmatpush2.msra.mxu1 %v520_v45 }
  0x72   : > { %614 = vmatprep.subr.mxu0 %v515_v46  ;;  %685 = vmatprep.subr.mxu1 %v517_v47 }
  0x73   : > { %615 = vmatpush2.msra.mxu0 %v514_v48  ;;  %686 = vmatpush2.msra.mxu1 %v516_v49 }
  0x74   : > { %616 = vmatprep.subr.mxu0 %v511_v50  ;;  %687 = vmatprep.subr.mxu1 %v513_v51 }
  0x75   : > { %617 = vmatpush2.msra.mxu0 %v510_v52  ;;  %688 = vmatpush2.msra.mxu1 %v512_v53 }
  0x76   : > { %618 = vmatprep.subr.mxu0 %v507_v54  ;;  %689 = vmatprep.subr.mxu1 %v509_v55  ;;  %v548_v55 = vlaneseq }
  0x77   : > { %619 = vmatpush2.msra.mxu0 %v506_v56  ;;  %690 = vmatpush2.msra.mxu1 %v508_v57 }
  0x78   : > { %620 = vmatprep.subr.mxu0 %v503_v58  ;;  %691 = vmatprep.subr.mxu1 %v505_v59  ;;  %v549_v56 = vshrl.u32 %v548_v55, 7  ;;  %v546_v58 = vld [vmem:[%s1818_s6] sm:$0xf] }
  0x79   : > { %621 = vmatpush2.msra.mxu0 %v502_v60  ;;  %692 = vmatpush2.msra.mxu1 %v504_v61 }
  0x7a   : > { %622 = vmatprep.subr.mxu0 %v499_v62  ;;  %693 = vmatprep.subr.mxu1 %v501_v63  ;;  %v550_v57 = vsub.s32 0, %v549_v56  ;;  %v554_v59 = vsub.s32 1, %v549_v56  ;;  %v558_v61 = vsub.s32 2, %v549_v56 }
  0x7b   : > { %623 = vmatpush2.msra.mxu0 %v498_v0  ;;  %694 = vmatpush2.msra.mxu1 %v500_v1 }
  0x7c   : > { %624 = vmatprep.subr.mxu0 %v495_v2  ;;  %695 = vmatprep.subr.mxu1 %v497_v3  ;;  %v551_v60 = vrot.slane %v546_v58, %v550_v57  ;;  %v555_v62 = vrot.slane %v546_v58, %v554_v59  ;;  %v559_v3 = vrot.slane %v546_v58, %v558_v61 }
  0x7d   : > { %625 = vmatpush2.msra.mxu0 %v494_v5  ;;  %696 = vmatpush2.msra.mxu1 %v496_v6 }
  0x7e   : > { %626 = vmatprep.subr.mxu0 %v491_v7  ;;  %697 = vmatprep.subr.mxu1 %v493_v8  ;;  %v562_v7 = vsub.s32 3, %v549_v56 }
  0x7f   : > { %627 = vmatpush2.msra.mxu0 %v490_v9  ;;  %698 = vmatpush2.msra.mxu1 %v492_v11 }
  0x80   : > { %628 = vmatprep.subr.mxu0 %v487_v12  ;;  %699 = vmatprep.subr.mxu1 %v489_v14  ;;  %v563_v9 = vrot.slane %v546_v58, %v562_v7 }
  0x81   : > { %629 = vmatpush2.msra.mxu0 %v486_v15  ;;  %700 = vmatpush2.msra.mxu1 %v488_v16 }
  0x82   : > { %630 = vmatprep.subr.mxu0 %v483_v17  ;;  %701 = vmatprep.subr.mxu1 %v485_v18 }
  0x83   : > { %631 = vmatpush2.msra.mxu0 %v482_v19  ;;  %632 = vmatprep.mubr.f32.mxu0 %v1705_v10 }
  0x84   : > { %702 = vmatpush2.msra.mxu1 %v484_v20  ;;  %703 = vmatprep.mubr.f32.mxu1 %v1705_v10  ;;  %v723_v20 = vld [vmem:[#allocation6] sm:$0xff] }
  0xbe   : > { %v1716_v44 = vpop.permute.xlu0 %408 }
  0xbf   : > { %vm410_vm1 = vcmp.eq.s32.totalorder %v1716_v44, 1 }
 0x102   : > { %v307_v22 = vpop.f32.mrf.mxu0 }
 0x103   : > { %v383_v24 = vadd.f32 %v307_v22, %v172_v21  ;;  %v378_v27 = vpop.f32.mrf.mxu1 }
 0x104   : > { %v309_v25 = vpop.f32.mrf.mxu0  ;;  %v385_v31 = vadd.f32 %v378_v27, %v174_v26 }
 0x105   : > { %v387_v28 = vmul.f32 0.5, %v383_v24  ;;  %v384_v29 = vadd.f32 %v309_v25, %v173_v23  ;;  %v380_v33 = vpop.f32.mrf.mxu1 }
 0x106   : > { %v386_v34 = vadd.f32 %v380_v33, %v175_v32 }
 0x107   : > { %981 = vtanh.f32 %v387_v28  ;;  %v391_v30 = vmul.f32 0.5, %v384_v29 }
 0x108   : > { %v396_v35 = vmul.f32 0.5, %v386_v34 }
 0x109   : > { %983 = vtanh.f32 %v391_v30 }
 0x10a   : > { %985 = vtanh.f32 %v385_v31 }
 0x10b   : > { %987 = vtanh.f32 %v396_v35 }
 0x114   : > { %v982_v36 = vpop.eup %981 }
 0x115   : > { %v389_v37 = vmul.f32 0.5, %v982_v36 }
 0x116   : > { %v984_v38 = vpop.eup %983 }
 0x117   : > { %v390_v39 = vadd.f32 0.5, %v389_v37  ;;  %v393_v40 = vmul.f32 0.5, %v984_v38  ;;  %v986_v41 = vpop.eup %985 }
 0x118   : > { %v988_v49 = vpop.eup %987 }
 0x119   : > { %v394_v43 = vadd.f32 0.5, %v393_v40  ;;  %v402_v46 = vmul.f32 %v986_v41, %v390_v39  ;;  %v398_v50 = vmul.f32 0.5, %v988_v49 }
 0x11b   : > { %v401_v45 = vmul.f32 %v400_v42, %v394_v43  ;;  %v399_v51 = vadd.f32 0.5, %v398_v50 }
 0x11d   : > { %v403_v47 = vadd.f32 %v402_v46, %v401_v45 }
 0x11f   : > { %989 = vtanh.f32 %v403_v47  ;;  %v411_v48 = vsel %vm410_vm1, %v403_v47, %v400_v42 }
 0x120   : > { %412 = vst [vmem:[#allocation5] sm:$0xff] %v411_v48 }
 0x12c   : > { %v990_v52 = vpop.eup %989 }
 0x12d   : > { %v405_v53 = vmul.f32 %v990_v52, %v399_v51 }
 0x12f   : > { %v414_v54 = vsel %vm410_vm1, %v405_v53, %v1313_v13 }
 0x130   : > { %415 = vst [vmem:[#allocation4] sm:$0xff] %v414_v54  ;;  %633 = vmatmul.mubr.f32.vlgmr.msra.gmra.mxu0 %v414_v54  ;;  %704 = vmatmul.mubr.f32.vlgmr.msra.gmra.mxu1 %v414_v54 }
 0x1f0   : > { %v634_v63 = vpop.f32.mrf.mxu0  ;;  %v705_v5 = vpop.f32.mrf.mxu1 }
 0x1f1   : > { %v635_v0 = vadd.f32 %v634_v63, %v551_v60  ;;  %v706_v8 = vadd.f32 %v705_v5, %v559_v3 }
 0x1f2   : > { %v636_v1 = vpop.f32.mrf.mxu0  ;;  %v707_v11 = vpop.f32.mrf.mxu1 }
 0x1f3   : > { %v710_v2 = vmul.f32 0.5, %v635_v0  ;;  %v637_v13 = vadd.f32 %v636_v1, %v555_v62  ;;  %v708_v12 = vadd.f32 %v707_v11, %v563_v9 }
 0x1f5   : > { %991 = vtanh.f32 %v710_v2  ;;  %v714_v6 = vmul.f32 0.5, %v637_v13  ;;  %v719_v14 = vmul.f32 0.5, %v708_v12 }
 0x1f7   : > { %993 = vtanh.f32 %v714_v6 }
 0x1f8   : > { %995 = vtanh.f32 %v706_v8 }
 0x1f9   : > { %997 = vtanh.f32 %v719_v14 }
 0x202   : > { %v992_v15 = vpop.eup %991 }
 0x203   : > { %v712_v16 = vmul.f32 0.5, %v992_v15 }
 0x204   : > { %v994_v17 = vpop.eup %993 }
 0x205   : > { %v713_v18 = vadd.f32 0.5, %v712_v16  ;;  %v716_v19 = vmul.f32 0.5, %v994_v17  ;;  %v996_v22 = vpop.eup %995 }
 0x206   : > { %v998_v27 = vpop.eup %997 }
 0x207   : > { %v717_v21 = vadd.f32 0.5, %v716_v19  ;;  %v725_v24 = vmul.f32 %v996_v22, %v713_v18  ;;  %v721_v28 = vmul.f32 0.5, %v998_v27 }
 0x209   : > { %v724_v23 = vmul.f32 %v723_v20, %v717_v21  ;;  %v722_v29 = vadd.f32 0.5, %v721_v28 }
 0x20b   : > { %v726_v25 = vadd.f32 %v725_v24, %v724_v23 }
 0x20d   : > { %999 = vtanh.f32 %v726_v25  ;;  %v729_v26 = vsel %vm410_vm1, %v726_v25, %v723_v20 }
 0x20e   : > { %730 = vst [vmem:[#allocation6] sm:$0xff] %v729_v26 }
 0x21a   : > { %v1000_v30 = vpop.eup %999  ;;  %95 = sbr.rel (!%p1110_p1) target bundleno = 17 (0x11), region = 154 }
 0x21b   : > { %v728_v31 = vmul.f32 %v1000_v30, %v722_v29 }
 0x21d   : > { %v732_v32 = vsel %vm410_vm1, %v728_v31, %v1705_v10 }
 0x21e   : > { %733 = vst [vmem:[#allocation4 + $0x8] sm:$0xff] %v732_v32 }
 0x21f PF:  { %v735_v33 = vld [vmem:[%s1815_s3] sm:$0xff]  ;;  %932 = vmatprep.subr.mxu0 %v1016_v4  ;;  %v758_v34 = vld [vmem:[%s1819_s7 + $0x78] sm:$0xff]  ;;  %v757_v10 = vld [vmem:[%s1819_s7 + $0x70] sm:$0xff]  ;;  %v1019_v35 = vmov 0   ;;  %vm1020_vm2 = vmmov 0  }
 0x220   :  { %1001 = vset.pattern.permute.xlu0 %v1019_v35  ;;  %933 = vmatpush3.msra.mxu0 %v758_v34  ;;  %v756_v36 = vld [vmem:[%s1819_s7 + $0x68] sm:$0xff]  ;;  %v755_v37 = vld [vmem:[%s1819_s7 + $0x60] sm:$0xff]  ;;  %v754_v38 = vld [vmem:[%s1819_s7 + $0x58] sm:$0xff] }
 0x221   :  { %738 = vperm.xlu0 %1001, %v735_v33   ;;  %934 = vmatprep.subr.mxu0 %v1016_v4  ;;  %v753_v39 = vld [vmem:[%s1819_s7 + $0x50] sm:$0xff]  ;;  %v752_v40 = vld [vmem:[%s1819_s7 + $0x48] sm:$0xff]  ;;  %v751_v41 = vld [vmem:[%s1819_s7 + $0x40] sm:$0xff] }
 0x222   :  { %935 = vmatpush3.msra.mxu0 %v757_v10  ;;  %964 = vmatprep.mubr.msk.f32.mxu0 %vm1020_vm2, %v1016_v4  ;;  %v750_v42 = vld [vmem:[%s1819_s7 + $0x38] sm:$0xff]  ;;  %v749_v43 = vld [vmem:[%s1819_s7 + $0x30] sm:$0xff]  ;;  %v748_v44 = vld [vmem:[%s1819_s7 + $0x28] sm:$0xff] }
 0x223   :  { %936 = vmatprep.subr.mxu0 %v1016_v4  ;;  %v747_v45 = vld [vmem:[%s1819_s7 + $0x20] sm:$0xff]  ;;  %v746_v46 = vld [vmem:[%s1819_s7 + $0x18] sm:$0xff]  ;;  %v745_v47 = vld [vmem:[%s1819_s7 + $0x10] sm:$0xff] }
 0x224   :  { %937 = vmatpush3.msra.mxu0 %v756_v36  ;;  %v744_v48 = vld [vmem:[%s1819_s7 + $0x8] sm:$0xff]  ;;  %v743_v49 = vld [vmem:[%s1819_s7] sm:$0xff] }
 0x225   :  { %938 = vmatprep.subr.mxu0 %v1016_v4  ;;  %v734_v50 = vld [vmem:[#allocation4 + $0x8] sm:$0xff]  ;;  %v909_v54 = vld [vmem:[%s1820_s8] ss:$0 sm:$0xff] }
 0x226   :  { %939 = vmatpush3.msra.mxu0 %v755_v37 }
 0x227   :  { %940 = vmatprep.subr.mxu0 %v1016_v4 }
 0x228   :  { %941 = vmatpush3.msra.mxu0 %v754_v38 }
 0x229   :  { %942 = vmatprep.subr.mxu0 %v1016_v4 }
 0x22a   :  { %943 = vmatpush3.msra.mxu0 %v753_v39 }
 0x22b   :  { %944 = vmatprep.subr.mxu0 %v1016_v4 }
 0x22c   :  { %945 = vmatpush3.msra.mxu0 %v752_v40 }
 0x22d   :  { %946 = vmatprep.subr.mxu0 %v1016_v4 }
 0x22e   :  { %947 = vmatpush3.msra.mxu0 %v751_v41 }
 0x22f   :  { %948 = vmatprep.subr.mxu0 %v1016_v4 }
 0x230   :  { %949 = vmatpush3.msra.mxu0 %v750_v42 }
 0x231   :  { %950 = vmatprep.subr.mxu0 %v1016_v4 }
 0x232   :  { %951 = vmatpush3.msra.mxu0 %v749_v43 }
 0x233   :  { %952 = vmatprep.subr.mxu0 %v1016_v4 }
 0x234   :  { %953 = vmatpush3.msra.mxu0 %v748_v44 }
 0x235   :  { %954 = vmatprep.subr.mxu0 %v1016_v4 }
 0x236   :  { %955 = vmatpush3.msra.mxu0 %v747_v45 }
 0x237   :  { %956 = vmatprep.subr.mxu0 %v1016_v4 }
 0x238   :  { %957 = vmatpush3.msra.mxu0 %v746_v46 }
 0x239   :  { %958 = vmatprep.subr.mxu0 %v1016_v4 }
 0x23a   :  { %959 = vmatpush3.msra.mxu0 %v745_v47 }
 0x23b   :  { %960 = vmatprep.subr.mxu0 %v1016_v4 }
 0x23c   :  { %961 = vmatpush3.msra.mxu0 %v744_v48 }
 0x23d   :  { %962 = vmatprep.subr.mxu0 %v1016_v4 }
 0x23e   :  { %963 = vmatpush3.msra.mxu0 %v743_v49 }
 0x29c   :  { %v739_v51 = vpop.permute.xlu0 %738 }
 0x29d   :  { %v741_v52 = vmul.f32 %v739_v51, %v734_v50 }
 0x29f   :  { %v742_v53 = vmax.f32 %v741_v52, 0.0 }
 0x2a1   :  { %965 = vmatmul.mubr.f32.vlgmr.msra.gmra.mxu0 %v742_v53 }
 0x361   :  { %v832_v55 = vpop.f32.mrf.mxu0 }
 0x362   :  { %v833_v56 = vadd.f32 %v909_v54, %v832_v55 }
 0x363   :  { %v966_v57 = vpop.f32.mrf.mxu0 }
 0x364   :  { %836 = vmax.xlane.f32.xlu0 %v833_v56 }
 0x3ed   :  { %v837_v58 = vpop.xlane.xlu0 %836 }
 0x3ee   :  { %v838_v59 = vsub.f32 %v833_v56, %v837_v58 }
 0x3f0   :  { %v839_v60 = vmul.f32 1.442695, %v838_v59 }
 0x3f2   :  { %1002 = vpow2.f32 %v839_v60 }
 0x3ff   :  { %v1003_v61 = vpop.eup %1002 }
 0x400   :  { %841 = vadd.xlane.f32.xlu1 %v1003_v61 }
 0x489   :  { %v842_v4 = vpop.xlane.xlu1 %841 }
 0x48a   :  { %1004 = vlog2.f32 %v842_v4 }
 0x497   :  { %v1005_v62 = vpop.eup %1004 }
 0x498   :  { %v844_v63 = vmul.f32 0.6931472, %v1005_v62 }
 0x49a   :  { %v845_v0 = vsub.f32 %v838_v59, %v844_v63 }
 0x49c   :  { %846 = vst [vmem:[%s1821_s9] sm:$0xff] %v845_v0 }
 0x49d   :  { %851 = vsyncmov [#allocation3] }
 0x4a0   :  { %s852_s8 = vpop.sfrf %851 }
 0x4a1   :  { %p910_p2 = scmp.ne.s32.totalorder %s852_s8, 0 }
 0x4a3   :  { %856 = shalt.err (%p910_p2)  }
 0x4a4   :  { %858 = vsyncmov [#allocation3 + $0x1] }
 0x4a7   :  { %s859_s3 = vpop.sfrf %858 }
 0x4a8   :  { %p911_p3 = scmp.ne.s32.totalorder %s859_s3, 0 }
 0x4aa   :  { %863 = shalt.err (%p911_p3)  }

</bundles_post_ra>
